<compile_context>
chip_gen: v7x
topology: tpu7x:2x2x1
jax: 0.10.0
libtpu: 0.0.40
codegen_flags: <defaults>
</compile_context>

<pallas_src>
import jax
import jax.numpy as jnp
from jax.experimental import pallas as pl
from jax.experimental.pallas import tpu as pltpu

NUM_LABELS = 4
MARGIN = 0.5
CALEC_DIM = 1024
ROB_DIM = 768
VOCAB = 100
IMG_DIM = 32

_GROUP_IN_BYTES = NUM_LABELS * (CALEC_DIM + ROB_DIM) * 2   # bf16 features / group


def _round_down(x, m):
    return max(m, (x // m) * m)


def _vmem_capacity_bytes():
    try:
        info = pltpu.get_tpu_info()
        cap = getattr(info, "vmem_capacity_bytes", None)
        if cap:
            return int(cap)
    except Exception:
        pass
    return 64 << 20   # conservative default (v7x per-TC)


def _default_tile_groups():
    # Size the batch tile from the real VMEM budget (double-buffered bf16
    # feature tiles must fit with headroom), not from a device-kind string.
    budget = min(_vmem_capacity_bytes() // 3, 48 << 20)
    tg = budget // (2 * _GROUP_IN_BYTES)
    return int(min(1024, _round_down(tg, 8)))


# ----------------------------------------------------------------------------
# Pallas kernel: block-diagonal MXU classifier -> softmax -> hinge + CE
# ----------------------------------------------------------------------------
def _make_head_kernel(with_loss, inv_b):
    def kernel(calec_ref, rob_ref, wc_ref, wr_ref, bias_ref, *rest):
        # calec_ref : (TBg, 4*1024) bf16   rob_ref : (TBg, 4*768) bf16
        # wc_ref    : (4096, 4)     bf16   wr_ref  : (3072, 4)    bf16  (resident)
        # bias_ref  : (1, 1)        f32                               (resident)
        if with_loss:
            label_ref, logits_ref, loss_ref = rest
        else:
            (logits_ref,) = rest

        # Block-diagonal classifier on the MXU: one matmul per encoder stream
        # yields all 4 candidate logits at once, accumulated in f32.
        g4 = (jnp.dot(calec_ref[...], wc_ref[...], preferred_element_type=jnp.float32)
              + jnp.dot(rob_ref[...], wr_ref[...], preferred_element_type=jnp.float32)
              + bias_ref[...])                                    # (TBg, 4) f32
        logits_ref[...] = g4

        if not with_loss:
            return

        label = label_ref[...]                                    # (TBg, 4) one-hot
        m = jnp.max(g4, axis=-1, keepdims=True)
        e = jnp.exp(g4 - m)
        s = jnp.sum(e, axis=-1, keepdims=True)
        p = e / s                                                 # softmax probs
        right = jnp.sum(p * label, axis=-1, keepdims=True)
        hinge = jnp.sum(jnp.maximum(MARGIN + p - right, 0.0),
                        axis=-1, keepdims=True)                   # (TBg, 1)
        logp = (g4 - m) - jnp.log(s)
        ce = -jnp.sum(label * logp, axis=-1, keepdims=True)       # (TBg, 1)

        # Per-group partial loss: hinge is summed over the batch, CE averaged.
        # Rows past the real batch (ragged last tile) are dropped by the masked
        # boundary writeback, so the whole grid stays "parallel" (megacore-able).
        loss_ref[...] = hinge + ce * inv_b
    return kernel


def ensemble_head(calec_feat, rob_feat, cls_w, cls_b, label2d=None,
                  tile_groups=None):
    """Fused ensemble head.

    calec_feat: (B*4, 1024) bf16/f32, rob_feat: (B*4, 768) bf16/f32,
    cls_w: (1792,) f32, cls_b: (1, 1) f32, label2d: (B, 4) one-hot or None.
    Returns (reshaped_logits (B, 4) f32, loss scalar f32 or None).
    """
    total_rows = calec_feat.shape[0]
    assert total_rows % NUM_LABELS == 0
    num_groups = total_rows // NUM_LABELS

    # Group-major lane-dense layout (free row-major reshape); bf16 cast is a
    # no-op because the encoders already emit bf16.
    calec_g = calec_feat.astype(jnp.bfloat16).reshape(num_groups, NUM_LABELS * CALEC_DIM)
    rob_g = rob_feat.astype(jnp.bfloat16).reshape(num_groups, NUM_LABELS * ROB_DIM)

    if tile_groups is None:
        tile_groups = _default_tile_groups()
    tbg = num_groups if num_groups <= tile_groups else tile_groups
    grid = (pl.cdiv(num_groups, tbg),)

    # Block-diagonal classifier weights: column k holds the weight slice for
    # candidate k (rows k*D..(k+1)*D), zeros elsewhere.  bf16 so the MXU sees
    # matched-precision operands (no implicit upcast of the streamed tile).
    w_flat = cls_w.reshape(-1).astype(jnp.float32)
    eye = jnp.eye(NUM_LABELS, dtype=jnp.float32)
    wc_bd = (eye[:, None, :] * w_flat[:CALEC_DIM][None, :, None]
             ).reshape(NUM_LABELS * CALEC_DIM, NUM_LABELS).astype(jnp.bfloat16)
    wr_bd = (eye[:, None, :] * w_flat[CALEC_DIM:][None, :, None]
             ).reshape(NUM_LABELS * ROB_DIM, NUM_LABELS).astype(jnp.bfloat16)
    bias = cls_b.reshape(1, 1).astype(jnp.float32)

    with_loss = label2d is not None

    in_specs = [
        pl.BlockSpec((tbg, NUM_LABELS * CALEC_DIM), lambda i: (i, 0)),
        pl.BlockSpec((tbg, NUM_LABELS * ROB_DIM), lambda i: (i, 0)),
        pl.BlockSpec((NUM_LABELS * CALEC_DIM, NUM_LABELS), lambda i: (0, 0)),  # resident
        pl.BlockSpec((NUM_LABELS * ROB_DIM, NUM_LABELS), lambda i: (0, 0)),    # resident
        pl.BlockSpec((1, 1), lambda i: (0, 0)),                                # resident
    ]
    inputs = [calec_g, rob_g, wc_bd, wr_bd, bias]

    logits_shape = jax.ShapeDtypeStruct((num_groups, NUM_LABELS), jnp.float32)
    logits_spec = pl.BlockSpec((tbg, NUM_LABELS), lambda i: (i, 0))

    bytes_accessed = (calec_g.size + rob_g.size + wc_bd.size + wr_bd.size) * 2 \
        + num_groups * NUM_LABELS * 4
    flops = 2 * num_groups * NUM_LABELS * (CALEC_DIM + ROB_DIM)
    transc = 0

    if with_loss:
        label_p = label2d.astype(jnp.float32)
        in_specs.append(pl.BlockSpec((tbg, NUM_LABELS), lambda i: (i, 0)))
        inputs.append(label_p)
        out_shape = (logits_shape,
                     jax.ShapeDtypeStruct((num_groups, 1), jnp.float32))
        out_specs = (logits_spec, pl.BlockSpec((tbg, 1), lambda i: (i, 0)))
        bytes_accessed += num_groups * NUM_LABELS * 4 + num_groups * 4
        transc = 2 * num_groups * NUM_LABELS
    else:
        out_shape = logits_shape
        out_specs = logits_spec

    # Explicit scoped-VMEM budget so large tiles don't silently trip the 32 MiB
    # default, while leaving headroom under the physical capacity.
    vmem_cap = _vmem_capacity_bytes()
    needed = (2 * tbg * _GROUP_IN_BYTES                       # double-buffered feats
              + 4 * tbg * NUM_LABELS * 4 * 2                  # labels + logits + loss
              + (wc_bd.size + wr_bd.size) * 2 + (4 << 20))    # weights + slack
    vmem_limit = int(min(max(32 << 20, needed),
                         max(32 << 20, vmem_cap - (8 << 20))))

    kernel = _make_head_kernel(with_loss, 1.0 / float(num_groups))
    result = pl.pallas_call(
        kernel,
        out_shape=out_shape,
        grid_spec=pltpu.PrefetchScalarGridSpec(
            num_scalar_prefetch=0,
            grid=grid,
            in_specs=in_specs,
            out_specs=out_specs,
        ),
        compiler_params=pltpu.CompilerParams(
            dimension_semantics=("parallel",),
            vmem_limit_bytes=vmem_limit),
        cost_estimate=pl.CostEstimate(
            flops=int(flops), transcendentals=int(transc),
            bytes_accessed=int(bytes_accessed)),
    )(*inputs)

    if with_loss:
        logits, per_group_loss = result
        return logits, jnp.sum(per_group_loss)
    return result, None


# ----------------------------------------------------------------------------
# Deterministic stand-ins for the external encoders (plain JAX glue)
# ----------------------------------------------------------------------------
# TODO(synk): the pretrained CALeC / RoBERTa encoders are external submodules of
# the original PyTorch model; they are stubbed with small deterministic encoders
# that emit correctly shaped bf16 features ((B*4,1024)+align_loss, (B*4,768)).
def calec_stub(params, input_ids, img_feat):
    emb = params["calec_emb"][input_ids]                         # (B4, L, 1024)
    txt = emb.mean(axis=1)                                       # (B4, 1024)
    img = jnp.tanh(img_feat @ params["calec_img_proj"]).mean(1)  # (B4, 1024)
    feat = jnp.tanh(txt + img).astype(jnp.bfloat16)              # bf16 at producer
    align_loss = jnp.mean(jnp.square(img_feat)) * jnp.float32(0.01)
    return feat, align_loss


def roberta_stub(params, input_ids, token_type_ids, attention_mask):
    emb = params["rob_emb"][input_ids]                           # (B4, L, 768)
    mask = attention_mask[..., None].astype(jnp.float32)
    pooled_in = (emb * mask).sum(1) / jnp.maximum(mask.sum(1), 1.0)
    pooled = jnp.tanh(pooled_in @ params["rob_pool_w"] + params["rob_pool_b"])
    return pooled.astype(jnp.bfloat16)                           # (B4, 768) bf16


def init_params(key):
    ks = jax.random.split(key, 5)
    return {
        "calec_emb": 0.02 * jax.random.normal(ks[0], (VOCAB, CALEC_DIM), jnp.float32),
        "calec_img_proj": 0.02 * jax.random.normal(ks[1], (IMG_DIM, CALEC_DIM), jnp.float32),
        "rob_emb": 0.02 * jax.random.normal(ks[2], (VOCAB, ROB_DIM), jnp.float32),
        "rob_pool_w": 0.02 * jax.random.normal(ks[3], (ROB_DIM, ROB_DIM), jnp.float32),
        "rob_pool_b": jnp.zeros((ROB_DIM,), jnp.float32),
        "cls_w": 0.02 * jax.random.normal(ks[4], (CALEC_DIM + ROB_DIM,), jnp.float32),
        "cls_b": jnp.full((1, 1), 0.05, jnp.float32),
    }


# ----------------------------------------------------------------------------
# Full forward (mirrors dual_ensemble_model_doubleloss.forward)
# ----------------------------------------------------------------------------
def dual_ensemble_forward(params, roberta_input_ids, roberta_token_type_ids,
                          roberta_attention_mask, input_ids, img_feat,
                          label=None, num_labels=NUM_LABELS, **unused):
    calec_out, align_loss = calec_stub(params, input_ids, img_feat)          # (B*4, 1024)
    rob_out = roberta_stub(params, roberta_input_ids, roberta_token_type_ids,
                           roberta_attention_mask)                           # (B*4, 768)
    B = calec_out.shape[0] // num_labels
    label2d = None if label is None else label.reshape(B, num_labels).astype(jnp.float32)

    reshaped_logits, loss = ensemble_head(calec_out, rob_out, params["cls_w"],
                                          params["cls_b"], label2d)
    return loss, align_loss, reshaped_logits


# ----------------------------------------------------------------------------
# Pure-JAX reference of the ensemble head (same bf16 quantization as kernel)
# ----------------------------------------------------------------------------
def reference_head(calec2d, rob2d, cls_w, cls_b, label2d):
    w_q = cls_w.reshape(1, -1).astype(jnp.bfloat16).astype(jnp.float32)
    feat = jnp.concatenate([calec2d, rob2d], axis=-1)            # (B*4, 1792)
    logits = jnp.sum(feat * w_q, axis=-1) + cls_b.reshape(())
    reshaped = logits.reshape(-1, NUM_LABELS)
    p = jax.nn.softmax(reshaped, axis=-1)
    right = jnp.sum(p * label2d, axis=-1, keepdims=True)
    hinge = jnp.sum(jnp.maximum(MARGIN + p - right, 0.0))
    logp = jax.nn.log_softmax(reshaped, axis=-1)
    ce = -jnp.mean(jnp.sum(label2d * logp, axis=-1))
    return hinge + ce, reshaped


if __name__ == "__main__":
    B = 2
    B4 = B * NUM_LABELS
    Lt, Lr, Ni = 8, 8, 4

    params = init_params(jax.random.PRNGKey(42))
    kin = jax.random.split(jax.random.PRNGKey(0), 5)

    input_ids = jax.random.randint(kin[0], (B4, Lt), 0, VOCAB, dtype=jnp.int32)
    roberta_input_ids = jax.random.randint(kin[1], (B4, Lr), 0, VOCAB, dtype=jnp.int32)
    roberta_token_type_ids = jnp.zeros((B4, Lr), jnp.int32)
    roberta_attention_mask = jnp.ones((B4, Lr), jnp.int32)
    img_feat = jax.random.normal(kin[2], (B4, Ni, IMG_DIM), dtype=jnp.float32)
    correct = jax.random.randint(kin[3], (B,), 0, NUM_LABELS)
    label = jax.nn.one_hot(correct, NUM_LABELS, dtype=jnp.float32).reshape(-1)   # (B*4,)

    # Training path (label given): logits + loss from the Pallas kernel.
    loss, align_loss, reshaped_logits = dual_ensemble_forward(
        params, roberta_input_ids, roberta_token_type_ids, roberta_attention_mask,
        input_ids, img_feat, label=label)
    jax.block_until_ready((loss, align_loss, reshaped_logits))

    # Inference path (label=None): loss branch skipped inside the kernel.
    loss_none, _, logits_infer = dual_ensemble_forward(
        params, roberta_input_ids, roberta_token_type_ids, roberta_attention_mask,
        input_ids, img_feat, label=None)
    assert loss_none is None
    jax.block_until_ready(logits_infer)

    # Consistency check against a pure-JAX reference with the same bf16
    # feature/weight quantization the kernel streams with.
    calec_out, _ = calec_stub(params, input_ids, img_feat)
    rob_out = roberta_stub(params, roberta_input_ids, roberta_token_type_ids,
                           roberta_attention_mask)
    ref_loss, ref_logits = reference_head(
        calec_out.astype(jnp.float32), rob_out.astype(jnp.float32),
        params["cls_w"], params["cls_b"], label.reshape(B, NUM_LABELS))

    assert jnp.allclose(reshaped_logits, ref_logits, atol=1e-3, rtol=1e-3)
    assert jnp.allclose(logits_infer, ref_logits, atol=1e-3, rtol=1e-3)
    assert jnp.allclose(loss, ref_loss, atol=1e-3, rtol=1e-3)

    print("KERNEL_OK")
</pallas_src>

<mosaic_0001>
module attributes {stable_mosaic.version = 11 : i64} {
  func.func @kernel(%arg0: i32, %arg1: memref<2x4096xbf16, #tpu.memory_space<vmem>>, %arg2: memref<2x3072xbf16, #tpu.memory_space<vmem>>, %arg3: memref<4096x4xbf16, #tpu.memory_space<vmem>>, %arg4: memref<3072x4xbf16, #tpu.memory_space<vmem>>, %arg5: memref<1x1xf32, #tpu.memory_space<vmem>>, %arg6: memref<2x4xf32, #tpu.memory_space<vmem>>, %arg7: memref<2x4xf32, #tpu.memory_space<vmem>>, %arg8: memref<2x1xf32, #tpu.memory_space<vmem>>) attributes {dimension_semantics = [#tpu.dimension_semantics<parallel>], iteration_bounds = array<i64: 1>, scalar_prefetch = 0 : i64, scratch_operands = 0 : i64, tpu.core_type = #tpu.core_type<tc>, window_params = [{transform_indices = @transform_0, window_bounds = array<i64: 2, 4096>}, {transform_indices = @transform_1, window_bounds = array<i64: 2, 3072>}, {pipeline_mode = #tpu.pipeline_mode<synchronous>, transform_indices = @transform_2, window_bounds = array<i64: 4096, 4>}, {pipeline_mode = #tpu.pipeline_mode<synchronous>, transform_indices = @transform_3, window_bounds = array<i64: 3072, 4>}, {pipeline_mode = #tpu.pipeline_mode<synchronous>, transform_indices = @transform_4, window_bounds = array<i64: 1, 1>}, {transform_indices = @transform_5, window_bounds = array<i64: 2, 4>}, {transform_indices = @transform_6, window_bounds = array<i64: 2, 4>}, {transform_indices = @transform_7, window_bounds = array<i64: 2, 1>}]} {
    %c0 = arith.constant 0 : index
    %c0_0 = arith.constant 0 : index
    %0 = vector.load %arg1[%c0, %c0_0] : memref<2x4096xbf16, #tpu.memory_space<vmem>>, vector<2x4096xbf16>
    %c0_1 = arith.constant 0 : index
    %c0_2 = arith.constant 0 : index
    %1 = vector.load %arg3[%c0_1, %c0_2] : memref<4096x4xbf16, #tpu.memory_space<vmem>>, vector<4096x4xbf16>
    %cst = arith.constant dense<0.000000e+00> : vector<2x4xf32>
    %2 = tpu.matmul %0, %1, %cst {dimension_numbers = #tpu.dot_dimension_numbers<[1], [0], [0], [1], [0, 0, 1, 1], [], []>} : vector<2x4096xbf16>, vector<4096x4xbf16>, vector<2x4xf32> -> vector<2x4xf32>
    %c0_3 = arith.constant 0 : index
    %c0_4 = arith.constant 0 : index
    %3 = vector.load %arg2[%c0_3, %c0_4] : memref<2x3072xbf16, #tpu.memory_space<vmem>>, vector<2x3072xbf16>
    %c0_5 = arith.constant 0 : index
    %c0_6 = arith.constant 0 : index
    %4 = vector.load %arg4[%c0_5, %c0_6] : memref<3072x4xbf16, #tpu.memory_space<vmem>>, vector<3072x4xbf16>
    %cst_7 = arith.constant dense<0.000000e+00> : vector<2x4xf32>
    %5 = tpu.matmul %3, %4, %cst_7 {dimension_numbers = #tpu.dot_dimension_numbers<[1], [0], [0], [1], [0, 0, 1, 1], [], []>} : vector<2x3072xbf16>, vector<3072x4xbf16>, vector<2x4xf32> -> vector<2x4xf32>
    %6 = arith.addf %2, %5 : vector<2x4xf32>
    %c0_8 = arith.constant 0 : index
    %c0_9 = arith.constant 0 : index
    %7 = vector.load %arg5[%c0_8, %c0_9] : memref<1x1xf32, #tpu.memory_space<vmem>>, vector<1x1xf32>
    %8 = vector.broadcast %7 : vector<1x1xf32> to vector<2x4xf32>
    %9 = arith.addf %6, %8 : vector<2x4xf32>
    %c0_10 = arith.constant 0 : index
    %c0_11 = arith.constant 0 : index
    %10 = vector.load %arg7[%c0_10, %c0_11] : memref<2x4xf32, #tpu.memory_space<vmem>>, vector<2x4xf32>
    tpu.vector_store %arg7[%c0_10, %c0_11], %9 {strides = array<i32>} : memref<2x4xf32, #tpu.memory_space<vmem>>, vector<2x4xf32>,
    %c0_12 = arith.constant 0 : index
    %c0_13 = arith.constant 0 : index
    %11 = vector.load %arg6[%c0_12, %c0_13] : memref<2x4xf32, #tpu.memory_space<vmem>>, vector<2x4xf32>
    %cst_14 = arith.constant dense<0xFF800000> : vector<2xf32>
    %12 = vector.multi_reduction <maximumf>, %9, %cst_14 [1] : vector<2x4xf32> to vector<2xf32>
    %13 = vector.shape_cast %12 : vector<2xf32> to vector<2x1xf32>
    %14 = vector.broadcast %13 : vector<2x1xf32> to vector<2x4xf32>
    %15 = arith.subf %9, %14 : vector<2x4xf32>
    %16 = math.exp %15 : vector<2x4xf32>
    %cst_15 = arith.constant dense<0.000000e+00> : vector<2xf32>
    %17 = vector.multi_reduction <add>, %16, %cst_15 [1] : vector<2x4xf32> to vector<2xf32>
    %18 = vector.shape_cast %17 : vector<2xf32> to vector<2x1xf32>
    %19 = vector.broadcast %18 : vector<2x1xf32> to vector<2x4xf32>
    %20 = arith.divf %16, %19 : vector<2x4xf32>
    %21 = arith.mulf %20, %11 : vector<2x4xf32>
    %cst_16 = arith.constant dense<0.000000e+00> : vector<2xf32>
    %22 = vector.multi_reduction <add>, %21, %cst_16 [1] : vector<2x4xf32> to vector<2xf32>
    %23 = vector.shape_cast %22 : vector<2xf32> to vector<2x1xf32>
    %cst_17 = arith.constant 5.000000e-01 : f32
    %24 = vector.broadcast %cst_17 : f32 to vector<2x4xf32>
    %25 = arith.addf %24, %20 : vector<2x4xf32>
    %26 = vector.broadcast %23 : vector<2x1xf32> to vector<2x4xf32>
    %27 = arith.subf %25, %26 : vector<2x4xf32>
    %cst_18 = arith.constant 0.000000e+00 : f32
    %28 = vector.broadcast %cst_18 : f32 to vector<2x4xf32>
    %29 = arith.maximumf %27, %28 : vector<2x4xf32>
    %cst_19 = arith.constant dense<0.000000e+00> : vector<2xf32>
    %30 = vector.multi_reduction <add>, %29, %cst_19 [1] : vector<2x4xf32> to vector<2xf32>
    %31 = vector.shape_cast %30 : vector<2xf32> to vector<2x1xf32>
    %32 = vector.broadcast %13 : vector<2x1xf32> to vector<2x4xf32>
    %33 = arith.subf %9, %32 : vector<2x4xf32>
    %34 = math.log %18 : vector<2x1xf32>
    %35 = vector.broadcast %34 : vector<2x1xf32> to vector<2x4xf32>
    %36 = arith.subf %33, %35 : vector<2x4xf32>
    %37 = arith.mulf %11, %36 : vector<2x4xf32>
    %cst_20 = arith.constant dense<0.000000e+00> : vector<2xf32>
    %38 = vector.multi_reduction <add>, %37, %cst_20 [1] : vector<2x4xf32> to vector<2xf32>
    %39 = vector.shape_cast %38 : vector<2xf32> to vector<2x1xf32>
    %cst_21 = arith.constant 0.000000e+00 : f32
    %40 = vector.broadcast %cst_21 : f32 to vector<2x1xf32>
    %41 = arith.subf %40, %39 : vector<2x1xf32>
    %cst_22 = arith.constant 5.000000e-01 : f32
    %42 = vector.broadcast %cst_22 : f32 to vector<2x1xf32>
    %43 = arith.mulf %41, %42 : vector<2x1xf32>
    %44 = arith.addf %31, %43 : vector<2x1xf32>
    %c0_23 = arith.constant 0 : index
    %c0_24 = arith.constant 0 : index
    %45 = vector.load %arg8[%c0_23, %c0_24] : memref<2x1xf32, #tpu.memory_space<vmem>>, vector<2x1xf32>
    tpu.vector_store %arg8[%c0_23, %c0_24], %44 {strides = array<i32>} : memref<2x1xf32, #tpu.memory_space<vmem>>, vector<2x1xf32>,
    return
  }
  func.func @transform_0(%arg0: i32) -> (i32, i32) {
    %c0_i32 = arith.constant 0 : i32
    %c0_i32_0 = arith.constant 0 : i32
    return %arg0, %c0_i32 : i32, i32
  }
  func.func @transform_1(%arg0: i32) -> (i32, i32) {
    %c0_i32 = arith.constant 0 : i32
    %c0_i32_0 = arith.constant 0 : i32
    return %arg0, %c0_i32 : i32, i32
  }
  func.func @transform_2(%arg0: i32) -> (i32, i32) {
    %c0_i32 = arith.constant 0 : i32
    %c0_i32_0 = arith.constant 0 : i32
    %c0_i32_1 = arith.constant 0 : i32
    return %c0_i32, %c0_i32_0 : i32, i32
  }
  func.func @transform_3(%arg0: i32) -> (i32, i32) {
    %c0_i32 = arith.constant 0 : i32
    %c0_i32_0 = arith.constant 0 : i32
    %c0_i32_1 = arith.constant 0 : i32
    return %c0_i32, %c0_i32_0 : i32, i32
  }
  func.func @transform_4(%arg0: i32) -> (i32, i32) {
    %c0_i32 = arith.constant 0 : i32
    %c0_i32_0 = arith.constant 0 : i32
    %c0_i32_1 = arith.constant 0 : i32
    return %c0_i32, %c0_i32_0 : i32, i32
  }
  func.func @transform_5(%arg0: i32) -> (i32, i32) {
    %c0_i32 = arith.constant 0 : i32
    %c0_i32_0 = arith.constant 0 : i32
    return %arg0, %c0_i32 : i32, i32
  }
  func.func @transform_6(%arg0: i32) -> (i32, i32) {
    %c0_i32 = arith.constant 0 : i32
    %c0_i32_0 = arith.constant 0 : i32
    return %arg0, %c0_i32 : i32, i32
  }
  func.func @transform_7(%arg0: i32) -> (i32, i32) {
    %c0_i32 = arith.constant 0 : i32
    %c0_i32_0 = arith.constant 0 : i32
    return %arg0, %c0_i32 : i32, i32
  }
}

</mosaic_0001>

<bundles_post_ra>
// kernel: tpu_custom_call.1
= control target key start
LH: loop header
LB: loop body
LE: loop exit
PB: predicated region body
PF: predicated region fallthrough
CT: control target
= control target key end

     0   :  { %s8297_s0 = inlined_call_operand.vmem [shape: bf16[2,4096], index: 0, kind: input, shape index: {}]   ;;  %s8298_s1 = inlined_call_operand.vmem [shape: bf16[2,3072], index: 1, kind: input, shape index: {}]   ;;  %s8299_s2 = inlined_call_operand.vmem [shape: bf16[4096,4], index: 2, kind: input, shape index: {}]   ;;  %s8300_s3 = inlined_call_operand.vmem [shape: bf16[3072,4], index: 3, kind: input, shape index: {}]   ;;  %s8301_s4 = inlined_call_operand.<no memory space> [shape: f32[1,1], index: 4, kind: input, shape index: {}]   ;;  %s8302_s5 = inlined_call_operand.vmem [shape: f32[2,4], index: 5, kind: input, shape index: {}]   ;;  %s8303_s6 = inlined_call_operand.hbm [shape: f32[2,4], index: 6, kind: output, shape index: {0}]   ;;  %s8304_s7 = inlined_call_operand.vmem [shape: f32[2,1], index: 7, kind: output, shape index: {1}]  }
   0x1   :  { %v13_v0 = vstv %s8301_s4 }
   0x2   :  { %14 = vst [vmem:[#allocation2] sm:$0x1] %v13_v0 }
   0x3   :  { %v6280_v1 = vld [vmem:[%s8300_s3 + $0x40] sm:$0xff]   ;;  %v6284_v5 = vld [vmem:[%s8300_s3 + $0x48] sm:$0xff]   ;;  %v6288_v9 = vld [vmem:[%s8300_s3 + $0x50] sm:$0xff]   ;;  %v939_v29 = vlaneseq  ;;  %v6765_v37 = vmov 1966171168  }
   0x4   :  { %v6281_v2 = vld [vmem:[%s8300_s3 + $0xc0] sm:$0xff]   ;;  %5660 = vmatprep.subr.bf16.mxu0 %v6280_v1  ;;  %v6285_v6 = vld [vmem:[%s8300_s3 + $0xc8] sm:$0xff]   ;;  %v6289_v10 = vld [vmem:[%s8300_s3 + $0xd0] sm:$0xff]   ;;  %v937_v38 = vunpack.c.l.s4 %v6765_v37 }
   0x5   :  { %v6282_v3 = vld [vmem:[%s8300_s3] sm:$0xff]   ;;  %5682 = vmatprep.subr.bf16.mxu1 %v6281_v2  ;;  %v6286_v7 = vld [vmem:[%s8300_s3 + $0x8] sm:$0xff]   ;;  %v6290_v11 = vld [vmem:[%s8300_s3 + $0x10] sm:$0xff]   ;;  %v940_v34 = vshrl.u32 %v939_v29, 7 }
   0x6   :  { %v6283_v4 = vld [vmem:[%s8300_s3 + $0x80] sm:$0xff]   ;;  %5661 = vmatpush3.bf16.msra.mxu0 %v6282_v3  ;;  %v6287_v8 = vld [vmem:[%s8300_s3 + $0x88] sm:$0xff]   ;;  %v6291_v12 = vld [vmem:[%s8300_s3 + $0x90] sm:$0xff]   ;;  %v938_v41 = vunpack.c.0.s8 %v937_v38 }
   0x7   :  { %5683 = vmatpush3.bf16.msra.mxu1 %v6283_v4  ;;  %5662 = vmatprep.subr.bf16.mxu0 %v6284_v5  ;;  %v6292_v13 = vld [vmem:[%s8300_s3 + $0x58] sm:$0xff]   ;;  %v6296_v17 = vld [vmem:[%s8300_s3 + $0x60] sm:$0xff]   ;;  %v6300_v21 = vld [vmem:[%s8300_s3 + $0x68] sm:$0xff]  }
   0x8   :  { %5684 = vmatprep.subr.bf16.mxu1 %v6285_v6  ;;  %v6293_v14 = vld [vmem:[%s8300_s3 + $0xd8] sm:$0xff]   ;;  %v6297_v18 = vld [vmem:[%s8300_s3 + $0xe0] sm:$0xff]   ;;  %v6301_v22 = vld [vmem:[%s8300_s3 + $0xe8] sm:$0xff]   ;;  %v6916_v42 = vsub.s32 %v938_v41, %v940_v34 }
   0x9   :  { %v6294_v15 = vld [vmem:[%s8300_s3 + $0x18] sm:$0xff]   ;;  %v6298_v19 = vld [vmem:[%s8300_s3 + $0x20] sm:$0xff]   ;;  %v6302_v23 = vld [vmem:[%s8300_s3 + $0x28] sm:$0xff]  }
   0xa   :  { %5663 = vmatpush3.bf16.msra.mxu0 %v6286_v7  ;;  %v6295_v16 = vld [vmem:[%s8300_s3 + $0x98] sm:$0xff]   ;;  %v6299_v20 = vld [vmem:[%s8300_s3 + $0xa0] sm:$0xff]   ;;  %v6303_v24 = vld [vmem:[%s8300_s3 + $0xa8] sm:$0xff]  }
   0xb   :  { %5685 = vmatpush3.bf16.msra.mxu1 %v6287_v8  ;;  %5664 = vmatprep.subr.bf16.mxu0 %v6288_v9  ;;  %v6304_v25 = vld [vmem:[%s8300_s3 + $0x70] sm:$0xff]   ;;  %v6308_v30 = vld [vmem:[%s8300_s3 + $0x78] sm:$0xff]   ;;  %v545_v35 = vld [vmem:[%s8298_s1] sm:$0xff] }
   0xc   :  { %5686 = vmatprep.subr.bf16.mxu1 %v6289_v10  ;;  %v6305_v26 = vld [vmem:[%s8300_s3 + $0xf0] sm:$0xff]   ;;  %v6309_v31 = vld [vmem:[%s8300_s3 + $0xf8] sm:$0xff]   ;;  %v6313_v36 = vld [vmem:[%s8300_s3 + $0x140] sm:$0xff]   ;;  %v935_v40 = vcombine.high %v545_v35, %v545_v35  ;;  %v942_v43 = vrot.slane %v545_v35, %v6916_v42 }
   0xd   :  { %v6306_v27 = vld [vmem:[%s8300_s3 + $0x30] sm:$0xff]   ;;  %v6310_v32 = vld [vmem:[%s8300_s3 + $0x38] sm:$0xff]   ;;  %v6314_v39 = vld [vmem:[%s8300_s3 + $0x1c0] sm:$0xff]  }
   0xe   :  { %5665 = vmatpush3.bf16.msra.mxu0 %v6290_v11  ;;  %v6307_v28 = vld [vmem:[%s8300_s3 + $0xb0] sm:$0xff]   ;;  %v6311_v33 = vld [vmem:[%s8300_s3 + $0xb8] sm:$0xff]   ;;  %v6920_v44 = vrot.slane %v935_v40, %v6916_v42  ;;  %v950_v45 = vcombine.high %v942_v43, %v942_v43  ;;  %v958_v46 = vrot.slane %v942_v43, %v6916_v42  ;;  %v6315_v48 = vld [vmem:[%s8300_s3 + $0x100] sm:$0xff]  }
   0xf   :  { %5687 = vmatpush3.bf16.msra.mxu1 %v6291_v12  ;;  %5666 = vmatprep.subr.bf16.mxu0 %v6292_v13  ;;  %v6316_v50 = vld [vmem:[%s8300_s3 + $0x180] sm:$0xff]   ;;  %v6317_v53 = vld [vmem:[%s8300_s3 + $0x148] sm:$0xff]   ;;  %v6321_v59 = vld [vmem:[%s8300_s3 + $0x150] sm:$0xff]  }
  0x10   :  { %5688 = vmatprep.subr.bf16.mxu1 %v6293_v14  ;;  %v951_v47 = vcombine.high %v6920_v44, %v6920_v44  ;;  %v972_v49 = vrot.slane %v950_v45, %v6916_v42  ;;  %v980_v52 = vcombine.high %v958_v46, %v958_v46  ;;  %v6318_v55 = vld [vmem:[%s8300_s3 + $0x1c8] sm:$0xff]   ;;  %v6322_v60 = vld [vmem:[%s8300_s3 + $0x1d0] sm:$0xff]   ;;  %v6325_v63 = vld [vmem:[%s8300_s3 + $0x158] sm:$0xff]  }
  0x11   :  { %v6319_v56 = vld [vmem:[%s8300_s3 + $0x108] sm:$0xff]   ;;  %v6323_v61 = vld [vmem:[%s8300_s3 + $0x110] sm:$0xff]   ;;  %v6326_v0 = vld [vmem:[%s8300_s3 + $0x1d8] sm:$0xff]  }
  0x12   :  { %5667 = vmatpush3.bf16.msra.mxu0 %v6294_v15  ;;  %v979_v51 = vrot.slane %v951_v47, %v6916_v42  ;;  %2290 = vmatprep.mubr.bf16.mxu0 %v972_v49  ;;  %v982_v54 = vcombine.high %v972_v49, %v972_v49  ;;  %v6320_v58 = vld [vmem:[%s8300_s3 + $0x188] sm:$0xff]   ;;  %v6324_v62 = vld [vmem:[%s8300_s3 + $0x190] sm:$0xff]   ;;  %v6327_v1 = vld [vmem:[%s8300_s3 + $0x118] sm:$0xff]  }
  0x13   :  { %5689 = vmatpush3.bf16.msra.mxu1 %v6295_v16  ;;  %5668 = vmatprep.subr.bf16.mxu0 %v6296_v17  ;;  %v6328_v2 = vld [vmem:[%s8300_s3 + $0x198] sm:$0xff]   ;;  %v6329_v3 = vld [vmem:[%s8300_s3 + $0x160] sm:$0xff]   ;;  %v6333_v7 = vld [vmem:[%s8300_s3 + $0x168] sm:$0xff]  }
  0x14   :  { %5690 = vmatprep.subr.bf16.mxu1 %v6297_v18  ;;  %v983_v57 = vcombine.high %v979_v51, %v979_v51  ;;  %2330 = vmatprep.mubr.bf16.mxu1 %v982_v54  ;;  %v6330_v4 = vld [vmem:[%s8300_s3 + $0x1e0] sm:$0xff]   ;;  %v6334_v8 = vld [vmem:[%s8300_s3 + $0x1e8] sm:$0xff]   ;;  %v6337_v11 = vld [vmem:[%s8300_s3 + $0x170] sm:$0xff]  }
  0x15   :  { %v6331_v5 = vld [vmem:[%s8300_s3 + $0x120] sm:$0xff]   ;;  %v6335_v9 = vld [vmem:[%s8300_s3 + $0x128] sm:$0xff]   ;;  %v6338_v12 = vld [vmem:[%s8300_s3 + $0x1f0] sm:$0xff]  }
  0x16   :  { %5669 = vmatpush3.bf16.msra.mxu0 %v6298_v19  ;;  %v6332_v6 = vld [vmem:[%s8300_s3 + $0x1a0] sm:$0xff]   ;;  %v6336_v10 = vld [vmem:[%s8300_s3 + $0x1a8] sm:$0xff]   ;;  %v6339_v13 = vld [vmem:[%s8300_s3 + $0x130] sm:$0xff]   ;;  %v965_v19 = vrot.slane %v6920_v44, %v6916_v42 }
  0x17   :  { %5691 = vmatpush3.bf16.msra.mxu1 %v6299_v20  ;;  %5670 = vmatprep.subr.bf16.mxu0 %v6300_v21  ;;  %v6340_v14 = vld [vmem:[%s8300_s3 + $0x1b0] sm:$0xff]   ;;  %v6341_v15 = vld [vmem:[%s8300_s3 + $0x178] sm:$0xff]   ;;  %v6345_v20 = vld [vmem:[%s8300_s3 + $0x240] sm:$0xff]  }
  0x18   :  { %5692 = vmatprep.subr.bf16.mxu1 %v6301_v22  ;;  %v6342_v16 = vld [vmem:[%s8300_s3 + $0x1f8] sm:$0xff]   ;;  %v6346_v21 = vld [vmem:[%s8300_s3 + $0x2c0] sm:$0xff]   ;;  %v6353_v29 = vld [vmem:[%s8300_s3 + $0x250] sm:$0xff]  }
  0x19   :  { %v6343_v17 = vld [vmem:[%s8300_s3 + $0x138] sm:$0xff]   ;;  %v6347_v22 = vld [vmem:[%s8300_s3 + $0x200] sm:$0xff]   ;;  %v6365_v41 = vld [vmem:[%s8300_s3 + $0x268] sm:$0xff]  }
  0x1a   :  { %5671 = vmatpush3.bf16.msra.mxu0 %v6302_v23  ;;  %v6344_v18 = vld [vmem:[%s8300_s3 + $0x1b8] sm:$0xff]   ;;  %v6348_v23 = vld [vmem:[%s8300_s3 + $0x280] sm:$0xff]   ;;  %v6366_v43 = vld [vmem:[%s8300_s3 + $0x2e8] sm:$0xff]  }
  0x1b   :  { %5693 = vmatpush3.bf16.msra.mxu1 %v6303_v24  ;;  %5672 = vmatprep.subr.bf16.mxu0 %v6304_v25  ;;  %v981_v24 = vcombine.high %v965_v19, %v965_v19  ;;  %v6349_v25 = vld [vmem:[%s8300_s3 + $0x248] sm:$0xff]   ;;  %v6358_v34 = vld [vmem:[%s8300_s3 + $0x2d8] sm:$0xff]   ;;  %v6361_v37 = vld [vmem:[%s8300_s3 + $0x260] sm:$0xff]  }
  0x1c   :  { %5694 = vmatprep.subr.bf16.mxu1 %v6305_v26  ;;  %v6350_v26 = vld [vmem:[%s8300_s3 + $0x2c8] sm:$0xff]   ;;  %v6359_v35 = vld [vmem:[%s8300_s3 + $0x218] sm:$0xff]   ;;  %v6362_v38 = vld [vmem:[%s8300_s3 + $0x2e0] sm:$0xff]  }
  0x1d   :  { %v6364_v40 = vld [vmem:[%s8300_s3 + $0x2a0] sm:$0xff]   ;;  %v6367_v44 = vld [vmem:[%s8300_s3 + $0x228] sm:$0xff]  }
  0x1e   :  { %5673 = vmatpush3.bf16.msra.mxu0 %v6306_v27  ;;  %v6351_v27 = vld [vmem:[%s8300_s3 + $0x208] sm:$0xff]  }
  0x1f   :  { %5695 = vmatpush3.bf16.msra.mxu1 %v6307_v28  ;;  %5674 = vmatprep.subr.bf16.mxu0 %v6308_v30  ;;  %v6352_v28 = vld [vmem:[%s8300_s3 + $0x288] sm:$0xff]   ;;  %v6354_v30 = vld [vmem:[%s8300_s3 + $0x2d0] sm:$0xff]  }
  0x20   :  { %5696 = vmatprep.subr.bf16.mxu1 %v6309_v31  ;;  %v6355_v31 = vld [vmem:[%s8300_s3 + $0x210] sm:$0xff]   ;;  %v6368_v45 = vld [vmem:[%s8300_s3 + $0x2a8] sm:$0xff]  }
  0x21   :  { %v546_v47 = vld [vmem:[%s8298_s1 + $0x8] sm:$0xff] }
  0x22   :  { %5675 = vmatpush3.bf16.msra.mxu0 %v6310_v32  ;;  %v6356_v32 = vld [vmem:[%s8300_s3 + $0x290] sm:$0xff]   ;;  %v991_v49 = vrot.slane %v546_v47, %v6916_v42 }
  0x23   :  { %5697 = vmatpush3.bf16.msra.mxu1 %v6311_v33  ;;  %5704 = vmatprep.subr.bf16.mxu0 %v6313_v36  ;;  %v6357_v33 = vld [vmem:[%s8300_s3 + $0x258] sm:$0xff]  }
  0x24   :  { %5726 = vmatprep.subr.bf16.mxu1 %v6314_v39  ;;  %v6360_v36 = vld [vmem:[%s8300_s3 + $0x298] sm:$0xff]   ;;  %v6363_v39 = vld [vmem:[%s8300_s3 + $0x220] sm:$0xff]  }
  0x25   :  { %2291 = vmatmul.mubr.bf16.vlgmr.msra.gmra.mrb[0].mxu0 %v958_v46  ;;  %v6369_v46 = vld [vmem:[%s8300_s3 + $0x270] sm:$0xff]  }
  0x26   :  { %5705 = vmatpush3.bf16.msra.mxu0 %v6315_v48  ;;  %2331 = vmatmul.mubr.bf16.vlgmr.msra.gmra.mrb[0].mxu1 %v980_v52  ;;  %v6370_v48 = vld [vmem:[%s8300_s3 + $0x2f0] sm:$0xff]  }
  0x27   :  { %5706 = vmatprep.subr.bf16.mxu0 %v6317_v53  ;;  %5727 = vmatpush3.bf16.msra.mxu1 %v6316_v50  ;;  %v984_v50 = vcombine.high %v546_v47, %v546_v47  ;;  %v6372_v52 = vld [vmem:[%s8300_s3 + $0x2b0] sm:$0xff]   ;;  %v999_v53 = vcombine.high %v991_v49, %v991_v49 }
  0x28   :  { %2370 = vmatprep.mubr.bf16.mxu0 %v979_v51  ;;  %5728 = vmatprep.subr.bf16.mxu1 %v6318_v55  ;;  %v6371_v51 = vld [vmem:[%s8300_s3 + $0x230] sm:$0xff]   ;;  %v6373_v55 = vld [vmem:[%s8300_s3 + $0x278] sm:$0xff]  }
  0x29   :  { %2410 = vmatprep.mubr.bf16.mxu1 %v983_v57  ;;  %v7108_v54 = vrot.slane %v984_v50, %v6916_v42  ;;  %v1021_v57 = vrot.slane %v999_v53, %v6916_v42  ;;  %v6420_v47 = vld [vmem:[%s8300_s3 + $0x410] sm:$0xff]   ;;  %v6423_v50 = vld [vmem:[%s8300_s3 + $0x4d8] sm:$0xff]   ;;  %v6426_v53 = vld [vmem:[%s8300_s3 + $0x460] sm:$0xff]  }
  0x2a   :  { %5707 = vmatpush3.bf16.msra.mxu0 %v6319_v56  ;;  %v6374_v56 = vld [vmem:[%s8300_s3 + $0x2f8] sm:$0xff]  }
  0x2b   :  { %5708 = vmatprep.subr.bf16.mxu0 %v6321_v59  ;;  %5729 = vmatpush3.bf16.msra.mxu1 %v6320_v58  ;;  %v1000_v58 = vcombine.high %v7108_v54, %v7108_v54  ;;  %v6375_v59 = vld [vmem:[%s8300_s3 + $0x238] sm:$0xff]  }
  0x2c   :  { %5730 = vmatprep.subr.bf16.mxu1 %v6322_v60  ;;  %v6376_v60 = vld [vmem:[%s8300_s3 + $0x2b8] sm:$0xff]  }
  0x2e   :  { %5709 = vmatpush3.bf16.msra.mxu0 %v6323_v61  ;;  %v1031_v61 = vcombine.high %v1021_v57, %v1021_v57 }
  0x2f   :  { %5710 = vmatprep.subr.bf16.mxu0 %v6325_v63  ;;  %5731 = vmatpush3.bf16.msra.mxu1 %v6324_v62  ;;  %v1007_v62 = vrot.slane %v991_v49, %v6916_v42  ;;  %v6377_v63 = vld [vmem:[%s8300_s3 + $0x340] sm:$0xff]   ;;  %v6422_v49 = vld [vmem:[%s8300_s3 + $0x458] sm:$0xff]  }
  0x30   :  { %5732 = vmatprep.subr.bf16.mxu1 %v6326_v0  ;;  %v6378_v0 = vld [vmem:[%s8300_s3 + $0x3c0] sm:$0xff]  }
  0x32   :  { %5711 = vmatpush3.bf16.msra.mxu0 %v6327_v1  ;;  %v1028_v1 = vrot.slane %v1000_v58, %v6916_v42  ;;  %v6431_v58 = vld [vmem:[%s8300_s3 + $0x4e8] sm:$0xff]  }
  0x33   :  { %5712 = vmatprep.subr.bf16.mxu0 %v6329_v3  ;;  %5733 = vmatpush3.bf16.msra.mxu1 %v6328_v2  ;;  %v6379_v2 = vld [vmem:[%s8300_s3 + $0x300] sm:$0xff]  }
  0x34   :  { %5734 = vmatprep.subr.bf16.mxu1 %v6330_v4  ;;  %v6380_v3 = vld [vmem:[%s8300_s3 + $0x380] sm:$0xff]   ;;  %v1029_v4 = vcombine.high %v1007_v62, %v1007_v62 }
  0x36   :  { %5713 = vmatpush3.bf16.msra.mxu0 %v6331_v5  ;;  %v6381_v5 = vld [vmem:[%s8300_s3 + $0x348] sm:$0xff]  }
  0x37   :  { %5714 = vmatprep.subr.bf16.mxu0 %v6333_v7  ;;  %5735 = vmatpush3.bf16.msra.mxu1 %v6332_v6  ;;  %v6382_v6 = vld [vmem:[%s8300_s3 + $0x3c8] sm:$0xff]   ;;  %v1032_v7 = vcombine.high %v1028_v1, %v1028_v1 }
  0x38   :  { %5736 = vmatprep.subr.bf16.mxu1 %v6334_v8  ;;  %v6383_v8 = vld [vmem:[%s8300_s3 + $0x308] sm:$0xff]  }
  0x3a   :  { %5715 = vmatpush3.bf16.msra.mxu0 %v6335_v9  ;;  %v6384_v9 = vld [vmem:[%s8300_s3 + $0x388] sm:$0xff]  }
  0x3b   :  { %5716 = vmatprep.subr.bf16.mxu0 %v6337_v11  ;;  %5737 = vmatpush3.bf16.msra.mxu1 %v6336_v10  ;;  %v6385_v10 = vld [vmem:[%s8300_s3 + $0x350] sm:$0xff]  }
  0x3c   :  { %5738 = vmatprep.subr.bf16.mxu1 %v6338_v12  ;;  %v6386_v11 = vld [vmem:[%s8300_s3 + $0x3d0] sm:$0xff]  }
  0x3d   :  { %v6387_v12 = vld [vmem:[%s8300_s3 + $0x310] sm:$0xff]  }
  0x3e   :  { %5717 = vmatpush3.bf16.msra.mxu0 %v6339_v13  ;;  %v6388_v13 = vld [vmem:[%s8300_s3 + $0x390] sm:$0xff]  }
  0x3f   :  { %5718 = vmatprep.subr.bf16.mxu0 %v6341_v15  ;;  %5739 = vmatpush3.bf16.msra.mxu1 %v6340_v14  ;;  %v6389_v14 = vld [vmem:[%s8300_s3 + $0x358] sm:$0xff]  }
  0x40   :  { %5740 = vmatprep.subr.bf16.mxu1 %v6342_v16  ;;  %v6390_v15 = vld [vmem:[%s8300_s3 + $0x3d8] sm:$0xff]  }
  0x41   :  { %v6391_v16 = vld [vmem:[%s8300_s3 + $0x318] sm:$0xff]  }
  0x42   :  { %5719 = vmatpush3.bf16.msra.mxu0 %v6343_v17  ;;  %v6392_v17 = vld [vmem:[%s8300_s3 + $0x398] sm:$0xff]  }
  0x43   :  { %5748 = vmatprep.subr.bf16.mxu0 %v6345_v20  ;;  %5741 = vmatpush3.bf16.msra.mxu1 %v6344_v18  ;;  %v6393_v18 = vld [vmem:[%s8300_s3 + $0x360] sm:$0xff]  }
  0x44   :  { %5770 = vmatprep.subr.bf16.mxu1 %v6346_v21  ;;  %v6395_v20 = vld [vmem:[%s8300_s3 + $0x320] sm:$0xff]  }
  0x45   :  { %2371 = vmatmul.mubr.bf16.vlgmr.msra.gmra.mrb[4].mxu0 %v965_v19  ;;  %v6394_v19 = vld [vmem:[%s8300_s3 + $0x3e0] sm:$0xff]  }
  0x46   :  { %5749 = vmatpush3.bf16.msra.mxu0 %v6347_v22  ;;  %2411 = vmatmul.mubr.bf16.vlgmr.msra.gmra.mrb[4].mxu1 %v981_v24  ;;  %v6396_v21 = vld [vmem:[%s8300_s3 + $0x3a0] sm:$0xff]   ;;  %v6397_v22 = vld [vmem:[%s8300_s3 + $0x368] sm:$0xff]  }
  0x47   :  { %5750 = vmatprep.subr.bf16.mxu0 %v6349_v25  ;;  %5771 = vmatpush3.bf16.msra.mxu1 %v6348_v23  ;;  %v6398_v23 = vld [vmem:[%s8300_s3 + $0x3e8] sm:$0xff]  }
  0x48   :  { %5772 = vmatprep.subr.bf16.mxu1 %v6350_v26  ;;  %2450 = vmatprep.mubr.bf16.mxu0 %v1021_v57  ;;  %v6399_v24 = vld [vmem:[%s8300_s3 + $0x328] sm:$0xff]   ;;  %v6401_v26 = vld [vmem:[%s8300_s3 + $0x370] sm:$0xff]  }
  0x49   :  { %2490 = vmatprep.mubr.bf16.mxu1 %v1031_v61  ;;  %v6400_v25 = vld [vmem:[%s8300_s3 + $0x3a8] sm:$0xff]   ;;  %v6434_v61 = vld [vmem:[%s8300_s3 + $0x470] sm:$0xff]  }
  0x4a   :  { %5751 = vmatpush3.bf16.msra.mxu0 %v6351_v27  ;;  %v6402_v27 = vld [vmem:[%s8300_s3 + $0x3f0] sm:$0xff]   ;;  %v6430_v57 = vld [vmem:[%s8300_s3 + $0x468] sm:$0xff]  }
  0x4b   :  { %5752 = vmatprep.subr.bf16.mxu0 %v6353_v29  ;;  %5773 = vmatpush3.bf16.msra.mxu1 %v6352_v28  ;;  %v6403_v28 = vld [vmem:[%s8300_s3 + $0x330] sm:$0xff]  }
  0x4c   :  { %5774 = vmatprep.subr.bf16.mxu1 %v6354_v30  ;;  %v6404_v29 = vld [vmem:[%s8300_s3 + $0x3b0] sm:$0xff]   ;;  %v6405_v30 = vld [vmem:[%s8300_s3 + $0x378] sm:$0xff]  }
  0x4e   :  { %5753 = vmatpush3.bf16.msra.mxu0 %v6355_v31  ;;  %v6406_v31 = vld [vmem:[%s8300_s3 + $0x3f8] sm:$0xff]  }
  0x4f   :  { %5754 = vmatprep.subr.bf16.mxu0 %v6357_v33  ;;  %5775 = vmatpush3.bf16.msra.mxu1 %v6356_v32  ;;  %v6407_v32 = vld [vmem:[%s8300_s3 + $0x338] sm:$0xff]  }
  0x50   :  { %5776 = vmatprep.subr.bf16.mxu1 %v6358_v34  ;;  %v6408_v33 = vld [vmem:[%s8300_s3 + $0x3b8] sm:$0xff]   ;;  %v1014_v34 = vrot.slane %v7108_v54, %v6916_v42  ;;  %v6427_v54 = vld [vmem:[%s8300_s3 + $0x4e0] sm:$0xff]  }
  0x52   :  { %5755 = vmatpush3.bf16.msra.mxu0 %v6359_v35  ;;  %v6410_v35 = vld [vmem:[%s8300_s3 + $0x440] sm:$0xff]  }
  0x53   :  { %5756 = vmatprep.subr.bf16.mxu0 %v6361_v37  ;;  %5777 = vmatpush3.bf16.msra.mxu1 %v6360_v36  ;;  %v6411_v36 = vld [vmem:[%s8300_s3 + $0x4c0] sm:$0xff]  }
  0x54   :  { %5778 = vmatprep.subr.bf16.mxu1 %v6362_v38  ;;  %v6412_v37 = vld [vmem:[%s8300_s3 + $0x400] sm:$0xff]  }
  0x55   :  { %v6413_v38 = vld [vmem:[%s8300_s3 + $0x480] sm:$0xff]  }
  0x56   :  { %5757 = vmatpush3.bf16.msra.mxu0 %v6363_v39  ;;  %v1030_v39 = vcombine.high %v1014_v34, %v1014_v34 }
  0x57   :  { %5758 = vmatprep.subr.bf16.mxu0 %v6365_v41  ;;  %5779 = vmatpush3.bf16.msra.mxu1 %v6364_v40  ;;  %v6414_v40 = vld [vmem:[%s8300_s3 + $0x448] sm:$0xff]  }
  0x58   :  { %5780 = vmatprep.subr.bf16.mxu1 %v6366_v43  ;;  %v6415_v41 = vld [vmem:[%s8300_s3 + $0x4c8] sm:$0xff]  }
  0x59   :  { %v6416_v43 = vld [vmem:[%s8300_s3 + $0x408] sm:$0xff]  }
  0x5a   :  { %5759 = vmatpush3.bf16.msra.mxu0 %v6367_v44  ;;  %v6417_v44 = vld [vmem:[%s8300_s3 + $0x488] sm:$0xff]  }
  0x5b   :  { %5760 = vmatprep.subr.bf16.mxu0 %v6369_v46  ;;  %5781 = vmatpush3.bf16.msra.mxu1 %v6368_v45  ;;  %v6418_v45 = vld [vmem:[%s8300_s3 + $0x450] sm:$0xff]  }
  0x5c   :  { %5782 = vmatprep.subr.bf16.mxu1 %v6370_v48  ;;  %v6419_v46 = vld [vmem:[%s8300_s3 + $0x4d0] sm:$0xff]  }
  0x5d   :  { %v6421_v48 = vld [vmem:[%s8300_s3 + $0x490] sm:$0xff]  }
  0x5e   :  { %5761 = vmatpush3.bf16.msra.mxu0 %v6371_v51  ;;  %v6424_v51 = vld [vmem:[%s8300_s3 + $0x418] sm:$0xff]  }
  0x5f   :  { %5762 = vmatprep.subr.bf16.mxu0 %v6373_v55  ;;  %5783 = vmatpush3.bf16.msra.mxu1 %v6372_v52  ;;  %v6425_v52 = vld [vmem:[%s8300_s3 + $0x498] sm:$0xff]   ;;  %v6428_v55 = vld [vmem:[%s8300_s3 + $0x420] sm:$0xff]  }
  0x60   :  { %5784 = vmatprep.subr.bf16.mxu1 %v6374_v56  ;;  %v6429_v56 = vld [vmem:[%s8300_s3 + $0x4a0] sm:$0xff]  }
  0x62   :  { %5763 = vmatpush3.bf16.msra.mxu0 %v6375_v59  ;;  %v6432_v59 = vld [vmem:[%s8300_s3 + $0x428] sm:$0xff]  }
  0x63   :  { %5792 = vmatprep.subr.bf16.mxu0 %v6377_v63  ;;  %5785 = vmatpush3.bf16.msra.mxu1 %v6376_v60  ;;  %v6433_v60 = vld [vmem:[%s8300_s3 + $0x4a8] sm:$0xff]   ;;  %v6435_v63 = vld [vmem:[%s8300_s3 + $0x4f0] sm:$0xff]  }
  0x64   :  { %5814 = vmatprep.subr.bf16.mxu1 %v6378_v0 }
  0x65   :  { %2451 = vmatmul.mubr.bf16.vlgmr.msra.gmra.mrb[8].mxu0 %v1007_v62  ;;  %v547_v62 = vld [vmem:[%s8298_s1 + $0x10] sm:$0xff] }
  0x66   :  { %5793 = vmatpush3.bf16.msra.mxu0 %v6379_v2  ;;  %2530 = vmatprep.mubr.bf16.mxu0 %v1028_v1  ;;  %v1040_v0 = vrot.slane %v547_v62, %v6916_v42  ;;  %v1033_v1 = vcombine.high %v547_v62, %v547_v62  ;;  %v6436_v2 = vld [vmem:[%s8300_s3 + $0x430] sm:$0xff]  }
  0x67   :  { %2491 = vmatmul.mubr.bf16.vlgmr.msra.gmra.mrb[8].mxu1 %v1029_v4  ;;  %5794 = vmatprep.subr.bf16.mxu0 %v6381_v5  ;;  %v6485_v62 = vld [vmem:[%s8299_s2 + $0x10] sm:$0xff]  }
  0x68   :  { %5815 = vmatpush3.bf16.msra.mxu1 %v6380_v3  ;;  %2570 = vmatprep.mubr.bf16.mxu1 %v1032_v7  ;;  %v6437_v3 = vld [vmem:[%s8300_s3 + $0x4b0] sm:$0xff]   ;;  %v1048_v4 = vcombine.high %v1040_v0, %v1040_v0  ;;  %v7314_v5 = vrot.slane %v1033_v1, %v6916_v42  ;;  %v6439_v7 = vld [vmem:[%s8300_s3 + $0x4f8] sm:$0xff]  }
  0x69   :  { %5816 = vmatprep.subr.bf16.mxu1 %v6382_v6  ;;  %v6438_v6 = vld [vmem:[%s8300_s3 + $0x478] sm:$0xff]  }
  0x6a   :  { %5795 = vmatpush3.bf16.msra.mxu0 %v6383_v8  ;;  %v1070_v8 = vrot.slane %v1048_v4, %v6916_v42  ;;  %v6488_v1 = vld [vmem:[%s8299_s2 + $0xd8] sm:$0xff]   ;;  %v6491_v4 = vld [vmem:[%s8299_s2 + $0x60] sm:$0xff]  }
  0x6b   :  { %5796 = vmatprep.subr.bf16.mxu0 %v6385_v10  ;;  %v6440_v10 = vld [vmem:[%s8300_s3 + $0x438] sm:$0xff]  }
  0x6c   :  { %5817 = vmatpush3.bf16.msra.mxu1 %v6384_v9  ;;  %v1049_v9 = vcombine.high %v7314_v5, %v7314_v5 }
  0x6d   :  { %5818 = vmatprep.subr.bf16.mxu1 %v6386_v11  ;;  %v6441_v11 = vld [vmem:[%s8300_s3 + $0x4b8] sm:$0xff]  }
  0x6e   :  { %5797 = vmatpush3.bf16.msra.mxu0 %v6387_v12  ;;  %v1080_v12 = vcombine.high %v1070_v8, %v1070_v8 }
  0x6f   :  { %5798 = vmatprep.subr.bf16.mxu0 %v6389_v14  ;;  %v6442_v14 = vld [vmem:[%s8300_s3 + $0x540] sm:$0xff]  }
  0x70   :  { %5819 = vmatpush3.bf16.msra.mxu1 %v6388_v13  ;;  %v1056_v13 = vrot.slane %v1040_v0, %v6916_v42  ;;  %v6487_v0 = vld [vmem:[%s8299_s2 + $0x58] sm:$0xff]  }
  0x71   :  { %5820 = vmatprep.subr.bf16.mxu1 %v6390_v15  ;;  %v6443_v15 = vld [vmem:[%s8300_s3 + $0x5c0] sm:$0xff]  }
  0x72   :  { %5799 = vmatpush3.bf16.msra.mxu0 %v6391_v16  ;;  %v1077_v16 = vrot.slane %v1049_v9, %v6916_v42  ;;  %v6496_v9 = vld [vmem:[%s8299_s2 + $0xe8] sm:$0xff]  }
  0x73   :  { %5800 = vmatprep.subr.bf16.mxu0 %v6393_v18  ;;  %v6445_v18 = vld [vmem:[%s8300_s3 + $0x580] sm:$0xff]  }
  0x74   :  { %5821 = vmatpush3.bf16.msra.mxu1 %v6392_v17  ;;  %v6444_v17 = vld [vmem:[%s8300_s3 + $0x500] sm:$0xff]  }
  0x75   :  { %5822 = vmatprep.subr.bf16.mxu1 %v6394_v19  ;;  %v1078_v19 = vcombine.high %v1056_v13, %v1056_v13 }
  0x76   :  { %5801 = vmatpush3.bf16.msra.mxu0 %v6395_v20  ;;  %v6446_v20 = vld [vmem:[%s8300_s3 + $0x548] sm:$0xff]  }
  0x77   :  { %5802 = vmatprep.subr.bf16.mxu0 %v6397_v22  ;;  %v1081_v22 = vcombine.high %v1077_v16, %v1077_v16 }
  0x78   :  { %5823 = vmatpush3.bf16.msra.mxu1 %v6396_v21  ;;  %v6447_v21 = vld [vmem:[%s8300_s3 + $0x5c8] sm:$0xff]  }
  0x79   :  { %5824 = vmatprep.subr.bf16.mxu1 %v6398_v23  ;;  %v6448_v23 = vld [vmem:[%s8300_s3 + $0x508] sm:$0xff]  }
  0x7a   :  { %5803 = vmatpush3.bf16.msra.mxu0 %v6399_v24  ;;  %v6449_v24 = vld [vmem:[%s8300_s3 + $0x588] sm:$0xff]  }
  0x7b   :  { %5804 = vmatprep.subr.bf16.mxu0 %v6401_v26  ;;  %v6451_v26 = vld [vmem:[%s8300_s3 + $0x5d0] sm:$0xff]  }
  0x7c   :  { %5825 = vmatpush3.bf16.msra.mxu1 %v6400_v25  ;;  %v6450_v25 = vld [vmem:[%s8300_s3 + $0x550] sm:$0xff]  }
  0x7d   :  { %5826 = vmatprep.subr.bf16.mxu1 %v6402_v27  ;;  %v6452_v27 = vld [vmem:[%s8300_s3 + $0x510] sm:$0xff]  }
  0x7e   :  { %5805 = vmatpush3.bf16.msra.mxu0 %v6403_v28  ;;  %v6453_v28 = vld [vmem:[%s8300_s3 + $0x590] sm:$0xff]  }
  0x7f   :  { %5806 = vmatprep.subr.bf16.mxu0 %v6405_v30  ;;  %v6455_v30 = vld [vmem:[%s8300_s3 + $0x5d8] sm:$0xff]  }
  0x80   :  { %5827 = vmatpush3.bf16.msra.mxu1 %v6404_v29  ;;  %v6454_v29 = vld [vmem:[%s8300_s3 + $0x558] sm:$0xff]  }
  0x81   :  { %5828 = vmatprep.subr.bf16.mxu1 %v6406_v31  ;;  %v6456_v31 = vld [vmem:[%s8300_s3 + $0x518] sm:$0xff]  }
  0x82   :  { %5807 = vmatpush3.bf16.msra.mxu0 %v6407_v32  ;;  %v6457_v32 = vld [vmem:[%s8300_s3 + $0x598] sm:$0xff]  }
  0x83   :  { %5836 = vmatprep.subr.bf16.mxu0 %v6410_v35  ;;  %v6460_v35 = vld [vmem:[%s8300_s3 + $0x520] sm:$0xff]  }
  0x84   :  { %5829 = vmatpush3.bf16.msra.mxu1 %v6408_v33  ;;  %v6458_v33 = vld [vmem:[%s8300_s3 + $0x560] sm:$0xff]  }
  0x85   :  { %2531 = vmatmul.mubr.bf16.vlgmr.msra.gmra.mrb[12].mxu0 %v1014_v34  ;;  %5858 = vmatprep.subr.bf16.mxu1 %v6411_v36  ;;  %v6459_v34 = vld [vmem:[%s8300_s3 + $0x5e0] sm:$0xff]  }
  0x86   :  { %5837 = vmatpush3.bf16.msra.mxu0 %v6412_v37  ;;  %2610 = vmatprep.mubr.bf16.mxu0 %v1070_v8  ;;  %v6461_v36 = vld [vmem:[%s8300_s3 + $0x5a0] sm:$0xff]   ;;  %v6462_v37 = vld [vmem:[%s8300_s3 + $0x568] sm:$0xff]  }
  0x87   :  { %2571 = vmatmul.mubr.bf16.vlgmr.msra.gmra.mrb[12].mxu1 %v1030_v39  ;;  %5838 = vmatprep.subr.bf16.mxu0 %v6414_v40  ;;  %v6464_v39 = vld [vmem:[%s8300_s3 + $0x528] sm:$0xff]  }
  0x88   :  { %5859 = vmatpush3.bf16.msra.mxu1 %v6413_v38  ;;  %2650 = vmatprep.mubr.bf16.mxu1 %v1080_v12  ;;  %v6463_v38 = vld [vmem:[%s8300_s3 + $0x5e8] sm:$0xff]   ;;  %v6499_v12 = vld [vmem:[%s8299_s2 + $0x70] sm:$0xff]  }
  0x89   :  { %5860 = vmatprep.subr.bf16.mxu1 %v6415_v41  ;;  %v6465_v40 = vld [vmem:[%s8300_s3 + $0x5a8] sm:$0xff]   ;;  %v6466_v41 = vld [vmem:[%s8300_s3 + $0x570] sm:$0xff]  }
  0x8a   :  { %5839 = vmatpush3.bf16.msra.mxu0 %v6416_v43  ;;  %v6467_v43 = vld [vmem:[%s8300_s3 + $0x5f0] sm:$0xff]   ;;  %v6495_v8 = vld [vmem:[%s8299_s2 + $0x68] sm:$0xff]  }
  0x8b   :  { %5840 = vmatprep.subr.bf16.mxu0 %v6418_v45  ;;  %v6469_v45 = vld [vmem:[%s8300_s3 + $0x5b0] sm:$0xff]  }
  0x8c   :  { %5861 = vmatpush3.bf16.msra.mxu1 %v6417_v44  ;;  %v6468_v44 = vld [vmem:[%s8300_s3 + $0x530] sm:$0xff]  }
  0x8d   :  { %5862 = vmatprep.subr.bf16.mxu1 %v6419_v46  ;;  %v6470_v46 = vld [vmem:[%s8300_s3 + $0x578] sm:$0xff]  }
  0x8e   :  { %5841 = vmatpush3.bf16.msra.mxu0 %v6420_v47  ;;  %v6471_v47 = vld [vmem:[%s8300_s3 + $0x5f8] sm:$0xff]  }
  0x8f   :  { %5842 = vmatprep.subr.bf16.mxu0 %v6422_v49  ;;  %v6473_v49 = vld [vmem:[%s8300_s3 + $0x5b8] sm:$0xff]  }
  0x90   :  { %5863 = vmatpush3.bf16.msra.mxu1 %v6421_v48  ;;  %v6472_v48 = vld [vmem:[%s8300_s3 + $0x538] sm:$0xff]  }
  0x91   :  { %5864 = vmatprep.subr.bf16.mxu1 %v6423_v50  ;;  %v1063_v50 = vrot.slane %v7314_v5, %v6916_v42  ;;  %v6492_v5 = vld [vmem:[%s8299_s2 + $0xe0] sm:$0xff]  }
  0x92   :  { %5843 = vmatpush3.bf16.msra.mxu0 %v6424_v51  ;;  %v6475_v51 = vld [vmem:[%s8299_s2 + $0x40] sm:$0xff]  }
  0x93   :  { %5844 = vmatprep.subr.bf16.mxu0 %v6426_v53  ;;  %v6477_v53 = vld [vmem:[%s8299_s2] sm:$0xff]  }
  0x94   :  { %5865 = vmatpush3.bf16.msra.mxu1 %v6425_v52  ;;  %v6476_v52 = vld [vmem:[%s8299_s2 + $0xc0] sm:$0xff]  }
  0x95   :  { %5866 = vmatprep.subr.bf16.mxu1 %v6427_v54  ;;  %v6478_v54 = vld [vmem:[%s8299_s2 + $0x80] sm:$0xff]  }
  0x96   :  { %5845 = vmatpush3.bf16.msra.mxu0 %v6428_v55  ;;  %v1079_v55 = vcombine.high %v1063_v50, %v1063_v50 }
  0x97   :  { %5846 = vmatprep.subr.bf16.mxu0 %v6430_v57  ;;  %v6480_v57 = vld [vmem:[%s8299_s2 + $0xc8] sm:$0xff]  }
  0x98   :  { %5867 = vmatpush3.bf16.msra.mxu1 %v6429_v56  ;;  %v6479_v56 = vld [vmem:[%s8299_s2 + $0x48] sm:$0xff]  }
  0x99   :  { %5868 = vmatprep.subr.bf16.mxu1 %v6431_v58  ;;  %v6481_v58 = vld [vmem:[%s8299_s2 + $0x8] sm:$0xff]  }
  0x9a   :  { %5847 = vmatpush3.bf16.msra.mxu0 %v6432_v59  ;;  %v6482_v59 = vld [vmem:[%s8299_s2 + $0x88] sm:$0xff]  }
  0x9b   :  { %5848 = vmatprep.subr.bf16.mxu0 %v6434_v61  ;;  %v6484_v61 = vld [vmem:[%s8299_s2 + $0xd0] sm:$0xff]  }
  0x9c   :  { %5869 = vmatpush3.bf16.msra.mxu1 %v6433_v60  ;;  %v6483_v60 = vld [vmem:[%s8299_s2 + $0x50] sm:$0xff]  }
  0x9d   :  { %5870 = vmatprep.subr.bf16.mxu1 %v6435_v63  ;;  %v6486_v63 = vld [vmem:[%s8299_s2 + $0x90] sm:$0xff]  }
  0x9e   :  { %5849 = vmatpush3.bf16.msra.mxu0 %v6436_v2  ;;  %v6489_v2 = vld [vmem:[%s8299_s2 + $0x18] sm:$0xff]  }
  0x9f   :  { %5850 = vmatprep.subr.bf16.mxu0 %v6438_v6  ;;  %v6493_v6 = vld [vmem:[%s8299_s2 + $0x20] sm:$0xff]  }
  0xa0   :  { %5871 = vmatpush3.bf16.msra.mxu1 %v6437_v3  ;;  %v6490_v3 = vld [vmem:[%s8299_s2 + $0x98] sm:$0xff]  }
  0xa1   :  { %5872 = vmatprep.subr.bf16.mxu1 %v6439_v7  ;;  %v6494_v7 = vld [vmem:[%s8299_s2 + $0xa0] sm:$0xff]  }
  0xa2   :  { %5851 = vmatpush3.bf16.msra.mxu0 %v6440_v10  ;;  %v6497_v10 = vld [vmem:[%s8299_s2 + $0x28] sm:$0xff]  }
  0xa3   :  { %5880 = vmatprep.subr.bf16.mxu0 %v6442_v14  ;;  %v29_v14 = vld [vmem:[%s8297_s0] sm:$0xff] }
  0xa4   :  { %5873 = vmatpush3.bf16.msra.mxu1 %v6441_v11  ;;  %v6498_v11 = vld [vmem:[%s8299_s2 + $0xa8] sm:$0xff]  }
  0xa5   :  { %2611 = vmatmul.mubr.bf16.vlgmr.msra.gmra.mrb[16].mxu0 %v1056_v13  ;;  %5902 = vmatprep.subr.bf16.mxu1 %v6443_v15  ;;  %v6500_v13 = vld [vmem:[%s8299_s2 + $0xf0] sm:$0xff]  }
  0xa6   :  { %5881 = vmatpush3.bf16.msra.mxu0 %v6444_v17  ;;  %2690 = vmatprep.mubr.bf16.mxu0 %v1077_v16  ;;  %v6501_v15 = vld [vmem:[%s8299_s2 + $0x30] sm:$0xff]   ;;  %v2749_v16 = vrot.slane %v29_v14, %v6916_v42  ;;  %v2742_v17 = vcombine.high %v29_v14, %v29_v14  ;;  %v6541_v14 = vld [vmem:[%s8299_s2 + $0x2c0] sm:$0xff]  }
  0xa7   :  { %2651 = vmatmul.mubr.bf16.vlgmr.msra.gmra.mrb[16].mxu1 %v1078_v19  ;;  %5882 = vmatprep.subr.bf16.mxu0 %v6446_v20  ;;  %v6503_v19 = vld [vmem:[%s8299_s2 + $0x78] sm:$0xff]  }
  0xa8   :  { %5903 = vmatpush3.bf16.msra.mxu1 %v6445_v18  ;;  %2730 = vmatprep.mubr.bf16.mxu1 %v1081_v22  ;;  %v6502_v18 = vld [vmem:[%s8299_s2 + $0xb0] sm:$0xff]   ;;  %v2757_v20 = vcombine.high %v2749_v16, %v2749_v16  ;;  %v6504_v22 = vld [vmem:[%s8299_s2 + $0xf8] sm:$0xff]  }
  0xa9   :  { %5904 = vmatprep.subr.bf16.mxu1 %v6447_v21  ;;  %v7523_v21 = vrot.slane %v2742_v17, %v6916_v42 }
  0xaa   :  { %5883 = vmatpush3.bf16.msra.mxu0 %v6448_v23  ;;  %v6505_v23 = vld [vmem:[%s8299_s2 + $0x38] sm:$0xff]  }
  0xab   :  { %5884 = vmatprep.subr.bf16.mxu0 %v6450_v25  ;;  %v2758_v25 = vcombine.high %v7523_v21, %v7523_v21 }
  0xac   :  { %5905 = vmatpush3.bf16.msra.mxu1 %v6449_v24  ;;  %v2779_v24 = vrot.slane %v2757_v20, %v6916_v42  ;;  %v6546_v20 = vld [vmem:[%s8299_s2 + $0x208] sm:$0xff]  }
  0xad   :  { %5906 = vmatprep.subr.bf16.mxu1 %v6451_v26  ;;  %v6506_v26 = vld [vmem:[%s8299_s2 + $0xb8] sm:$0xff]  }
  0xae   :  { %5885 = vmatpush3.bf16.msra.mxu0 %v6452_v27  ;;  %v2789_v27 = vcombine.high %v2779_v24, %v2779_v24 }
  0xaf   :  { %5886 = vmatprep.subr.bf16.mxu0 %v6454_v29  ;;  %v6507_v29 = vld [vmem:[%s8299_s2 + $0x140] sm:$0xff]  }
  0xb0   :  { %5907 = vmatpush3.bf16.msra.mxu1 %v6453_v28  ;;  %v2765_v28 = vrot.slane %v2749_v16, %v6916_v42  ;;  %v6543_v16 = vld [vmem:[%s8299_s2 + $0x280] sm:$0xff]  }
  0xb1   :  { %5908 = vmatprep.subr.bf16.mxu1 %v6455_v30  ;;  %v6508_v30 = vld [vmem:[%s8299_s2 + $0x1c0] sm:$0xff]  }
  0xb2   :  { %5887 = vmatpush3.bf16.msra.mxu0 %v6456_v31  ;;  %v2786_v31 = vrot.slane %v2758_v25, %v6916_v42  ;;  %v6551_v25 = vld [vmem:[%s8299_s2 + $0x290] sm:$0xff]  }
  0xb3   :  { %5888 = vmatprep.subr.bf16.mxu0 %v6458_v33  ;;  %v6510_v33 = vld [vmem:[%s8299_s2 + $0x180] sm:$0xff]  }
  0xb4   :  { %5909 = vmatpush3.bf16.msra.mxu1 %v6457_v32  ;;  %v6509_v32 = vld [vmem:[%s8299_s2 + $0x100] sm:$0xff]  }
  0xb5   :  { %5910 = vmatprep.subr.bf16.mxu1 %v6459_v34  ;;  %v2787_v34 = vcombine.high %v2765_v28, %v2765_v28 }
  0xb6   :  { %5889 = vmatpush3.bf16.msra.mxu0 %v6460_v35  ;;  %v6511_v35 = vld [vmem:[%s8299_s2 + $0x148] sm:$0xff]  }
  0xb7   :  { %5890 = vmatprep.subr.bf16.mxu0 %v6462_v37  ;;  %v2790_v37 = vcombine.high %v2786_v31, %v2786_v31 }
  0xb8   :  { %5911 = vmatpush3.bf16.msra.mxu1 %v6461_v36  ;;  %v6512_v36 = vld [vmem:[%s8299_s2 + $0x1c8] sm:$0xff]  }
  0xb9   :  { %5912 = vmatprep.subr.bf16.mxu1 %v6463_v38  ;;  %v6513_v38 = vld [vmem:[%s8299_s2 + $0x108] sm:$0xff]  }
  0xba   :  { %5891 = vmatpush3.bf16.msra.mxu0 %v6464_v39  ;;  %v6514_v39 = vld [vmem:[%s8299_s2 + $0x188] sm:$0xff]  }
  0xbb   :  { %5892 = vmatprep.subr.bf16.mxu0 %v6466_v41  ;;  %v6516_v41 = vld [vmem:[%s8299_s2 + $0x1d0] sm:$0xff]  }
  0xbc   :  { %5913 = vmatpush3.bf16.msra.mxu1 %v6465_v40  ;;  %v6515_v40 = vld [vmem:[%s8299_s2 + $0x150] sm:$0xff]  }
  0xbd   :  { %5914 = vmatprep.subr.bf16.mxu1 %v6467_v43  ;;  %v6517_v43 = vld [vmem:[%s8299_s2 + $0x110] sm:$0xff]  }
  0xbe   :  { %5893 = vmatpush3.bf16.msra.mxu0 %v6468_v44  ;;  %v6518_v44 = vld [vmem:[%s8299_s2 + $0x190] sm:$0xff]  }
  0xbf   :  { %5894 = vmatprep.subr.bf16.mxu0 %v6470_v46  ;;  %v6520_v46 = vld [vmem:[%s8299_s2 + $0x1d8] sm:$0xff]  }
  0xc0   :  { %5915 = vmatpush3.bf16.msra.mxu1 %v6469_v45  ;;  %v6519_v45 = vld [vmem:[%s8299_s2 + $0x158] sm:$0xff]  }
  0xc1   :  { %5916 = vmatprep.subr.bf16.mxu1 %v6471_v47  ;;  %v6521_v47 = vld [vmem:[%s8299_s2 + $0x118] sm:$0xff]  }
  0xc2   :  { %5895 = vmatpush3.bf16.msra.mxu0 %v6472_v48  ;;  %v6522_v48 = vld [vmem:[%s8299_s2 + $0x198] sm:$0xff]  }
  0xc3   :  { %5924 = vmatprep.subr.bf16.mxu0 %v6475_v51  ;;  %v6525_v51 = vld [vmem:[%s8299_s2 + $0x120] sm:$0xff]  }
  0xc4   :  { %5917 = vmatpush3.bf16.msra.mxu1 %v6473_v49  ;;  %v6523_v49 = vld [vmem:[%s8299_s2 + $0x160] sm:$0xff]  }
  0xc5   :  { %2691 = vmatmul.mubr.bf16.vlgmr.msra.gmra.mrb[20].mxu0 %v1063_v50  ;;  %5946 = vmatprep.subr.bf16.mxu1 %v6476_v52  ;;  %v6524_v50 = vld [vmem:[%s8299_s2 + $0x1e0] sm:$0xff]  }
  0xc6   :  { %5925 = vmatpush3.bf16.msra.mxu0 %v6477_v53  ;;  %4538 = vmatprep.mubr.bf16.mxu0 %v2779_v24  ;;  %v6526_v52 = vld [vmem:[%s8299_s2 + $0x1a0] sm:$0xff]   ;;  %v6527_v53 = vld [vmem:[%s8299_s2 + $0x168] sm:$0xff]   ;;  %v6550_v24 = vld [vmem:[%s8299_s2 + $0x210] sm:$0xff]  }
  0xc7   :  { %2731 = vmatmul.mubr.bf16.vlgmr.msra.gmra.mrb[20].mxu1 %v1079_v55  ;;  %5926 = vmatprep.subr.bf16.mxu0 %v6479_v56  ;;  %v6529_v55 = vld [vmem:[%s8299_s2 + $0x128] sm:$0xff]  }
  0xc8   :  { %5947 = vmatpush3.bf16.msra.mxu1 %v6478_v54  ;;  %4578 = vmatprep.mubr.bf16.mxu1 %v2789_v27  ;;  %v6528_v54 = vld [vmem:[%s8299_s2 + $0x1e8] sm:$0xff]   ;;  %v6553_v27 = vld [vmem:[%s8299_s2 + $0x2d8] sm:$0xff]  }
  0xc9   :  { %5948 = vmatprep.subr.bf16.mxu1 %v6480_v57  ;;  %v6530_v56 = vld [vmem:[%s8299_s2 + $0x1a8] sm:$0xff]   ;;  %v6531_v57 = vld [vmem:[%s8299_s2 + $0x170] sm:$0xff]  }
  0xca   :  { %5927 = vmatpush3.bf16.msra.mxu0 %v6481_v58 }
  0xcb   :  { %5928 = vmatprep.subr.bf16.mxu0 %v6483_v60 }
  0xcc   :  { %5949 = vmatpush3.bf16.msra.mxu1 %v6482_v59  ;;  %v6532_v59 = vld [vmem:[%s8299_s2 + $0x1f0] sm:$0xff]  }
  0xcd   :  { %5950 = vmatprep.subr.bf16.mxu1 %v6484_v61  ;;  %v6533_v61 = vld [vmem:[%s8299_s2 + $0x130] sm:$0xff]  }
  0xce   :  { %5929 = vmatpush3.bf16.msra.mxu0 %v6485_v62 }
  0xcf   :  { %5930 = vmatprep.subr.bf16.mxu0 %v6487_v0 }
  0xd0   :  { %5951 = vmatpush3.bf16.msra.mxu1 %v6486_v63 }
  0xd1   :  { %5952 = vmatprep.subr.bf16.mxu1 %v6488_v1  ;;  %v6534_v1 = vld [vmem:[%s8299_s2 + $0x1b0] sm:$0xff]  }
  0xd2   :  { %5931 = vmatpush3.bf16.msra.mxu0 %v6489_v2  ;;  %v6535_v2 = vld [vmem:[%s8299_s2 + $0x178] sm:$0xff]  }
  0xd3   :  { %5932 = vmatprep.subr.bf16.mxu0 %v6491_v4 }
  0xd4   :  { %5953 = vmatpush3.bf16.msra.mxu1 %v6490_v3 }
  0xd5   :  { %5954 = vmatprep.subr.bf16.mxu1 %v6492_v5 }
  0xd6   :  { %5933 = vmatpush3.bf16.msra.mxu0 %v6493_v6 }
  0xd7   :  { %5934 = vmatprep.subr.bf16.mxu0 %v6495_v8 }
  0xd8   :  { %5955 = vmatpush3.bf16.msra.mxu1 %v6494_v7  ;;  %v6536_v7 = vld [vmem:[%s8299_s2 + $0x1f8] sm:$0xff]  }
  0xd9   :  { %5956 = vmatprep.subr.bf16.mxu1 %v6496_v9  ;;  %v6537_v9 = vld [vmem:[%s8299_s2 + $0x138] sm:$0xff]  }
  0xda   :  { %5935 = vmatpush3.bf16.msra.mxu0 %v6497_v10 }
  0xdb   :  { %5936 = vmatprep.subr.bf16.mxu0 %v6499_v12  ;;  %v2772_v12 = vrot.slane %v7523_v21, %v6916_v42  ;;  %v6547_v21 = vld [vmem:[%s8299_s2 + $0x288] sm:$0xff]  }
  0xdc   :  { %5957 = vmatpush3.bf16.msra.mxu1 %v6498_v11  ;;  %v6538_v11 = vld [vmem:[%s8299_s2 + $0x1b8] sm:$0xff]  }
  0xdd   :  { %5958 = vmatprep.subr.bf16.mxu1 %v6500_v13  ;;  %v6540_v13 = vld [vmem:[%s8299_s2 + $0x240] sm:$0xff]   ;;  %v2788_v17 = vcombine.high %v2772_v12, %v2772_v12 }
  0xde   :  { %5937 = vmatpush3.bf16.msra.mxu0 %v6501_v15  ;;  %v6542_v15 = vld [vmem:[%s8299_s2 + $0x200] sm:$0xff]  }
  0xdf   :  { %5938 = vmatprep.subr.bf16.mxu0 %v6503_v19  ;;  %v6545_v19 = vld [vmem:[%s8299_s2 + $0x2c8] sm:$0xff]  }
  0xe0   :  { %5959 = vmatpush3.bf16.msra.mxu1 %v6502_v18  ;;  %v6544_v18 = vld [vmem:[%s8299_s2 + $0x248] sm:$0xff]  }
  0xe1   :  { %5960 = vmatprep.subr.bf16.mxu1 %v6504_v22  ;;  %v6548_v22 = vld [vmem:[%s8299_s2 + $0x250] sm:$0xff]  }
  0xe2   :  { %5939 = vmatpush3.bf16.msra.mxu0 %v6505_v23  ;;  %v6549_v23 = vld [vmem:[%s8299_s2 + $0x2d0] sm:$0xff]  }
  0xe3   :  { %5968 = vmatprep.subr.bf16.mxu0 %v6507_v29  ;;  %v6555_v29 = vld [vmem:[%s8299_s2 + $0x298] sm:$0xff]  }
  0xe4   :  { %5961 = vmatpush3.bf16.msra.mxu1 %v6506_v26  ;;  %v6552_v26 = vld [vmem:[%s8299_s2 + $0x258] sm:$0xff]  }
  0xe5   :  { %4539 = vmatmul.mubr.bf16.vlgmr.msra.gmra.mrb[24].mxu0 %v2765_v28  ;;  %5990 = vmatprep.subr.bf16.mxu1 %v6508_v30  ;;  %v6554_v28 = vld [vmem:[%s8299_s2 + $0x218] sm:$0xff]   ;;  %v6556_v30 = vld [vmem:[%s8299_s2 + $0x260] sm:$0xff]  }
  0xe6   :  { %5969 = vmatpush3.bf16.msra.mxu0 %v6509_v32  ;;  %4618 = vmatprep.mubr.bf16.mxu0 %v2786_v31  ;;  %v6557_v31 = vld [vmem:[%s8299_s2 + $0x2e0] sm:$0xff]  }
  0xe7   :  { %4579 = vmatmul.mubr.bf16.vlgmr.msra.gmra.mrb[24].mxu1 %v2787_v34  ;;  %5970 = vmatprep.subr.bf16.mxu0 %v6511_v35  ;;  %v6558_v32 = vld [vmem:[%s8299_s2 + $0x220] sm:$0xff]   ;;  %v6560_v34 = vld [vmem:[%s8299_s2 + $0x268] sm:$0xff]  }
  0xe8   :  { %5991 = vmatpush3.bf16.msra.mxu1 %v6510_v33  ;;  %4658 = vmatprep.mubr.bf16.mxu1 %v2790_v37  ;;  %v6559_v33 = vld [vmem:[%s8299_s2 + $0x2a0] sm:$0xff]   ;;  %v6561_v35 = vld [vmem:[%s8299_s2 + $0x2e8] sm:$0xff]  }
  0xe9   :  { %5992 = vmatprep.subr.bf16.mxu1 %v6512_v36  ;;  %v6562_v36 = vld [vmem:[%s8299_s2 + $0x228] sm:$0xff]  }
  0xea   :  { %5971 = vmatpush3.bf16.msra.mxu0 %v6513_v38  ;;  %v6563_v37 = vld [vmem:[%s8299_s2 + $0x2a8] sm:$0xff]   ;;  %v6564_v38 = vld [vmem:[%s8299_s2 + $0x270] sm:$0xff]  }
  0xeb   :  { %5972 = vmatprep.subr.bf16.mxu0 %v6515_v40  ;;  %v6565_v40 = vld [vmem:[%s8299_s2 + $0x2f0] sm:$0xff]  }
  0xec   :  { %5993 = vmatpush3.bf16.msra.mxu1 %v6514_v39 }
  0xed   :  { %5994 = vmatprep.subr.bf16.mxu1 %v6516_v41  ;;  %v30_v41 = vld [vmem:[%s8297_s0 + $0x8] sm:$0xff] }
  0xee   :  { %5973 = vmatpush3.bf16.msra.mxu0 %v6517_v43 }
  0xef   :  { %5974 = vmatprep.subr.bf16.mxu0 %v6519_v45  ;;  %v2798_v45 = vrot.slane %v30_v41, %v6916_v42 }
  0xf0   :  { %5995 = vmatpush3.bf16.msra.mxu1 %v6518_v44  ;;  %v6566_v44 = vld [vmem:[%s8299_s2 + $0x230] sm:$0xff]  }
  0xf1   :  { %5996 = vmatprep.subr.bf16.mxu1 %v6520_v46  ;;  %v2791_v46 = vcombine.high %v30_v41, %v30_v41 }
  0xf2   :  { %5975 = vmatpush3.bf16.msra.mxu0 %v6521_v47 }
  0xf3   :  { %5976 = vmatprep.subr.bf16.mxu0 %v6523_v49 }
  0xf4   :  { %5997 = vmatpush3.bf16.msra.mxu1 %v6522_v48 }
  0xf5   :  { %5998 = vmatprep.subr.bf16.mxu1 %v6524_v50 }
  0xf6   :  { %5977 = vmatpush3.bf16.msra.mxu0 %v6525_v51 }
  0xf7   :  { %5978 = vmatprep.subr.bf16.mxu0 %v6527_v53  ;;  %v6568_v53 = vld [vmem:[%s8299_s2 + $0x278] sm:$0xff]  }
  0xf8   :  { %5999 = vmatpush3.bf16.msra.mxu1 %v6526_v52  ;;  %v5676_v58 = vpop.f32.mrb[0].mxu0  ;;  %v6567_v52 = vld [vmem:[%s8299_s2 + $0x2b0] sm:$0xff]  }
  0xf9   :  { %v5677_v60 = vpop.f32.mrb[1].mxu0  ;;  %6000 = vmatprep.subr.bf16.mxu1 %v6528_v54  ;;  %v5698_v62 = vpop.f32.mrb[0].mxu1  ;;  %v2806_v54 = vcombine.high %v2798_v45, %v2798_v45 }
  0xfa   :  { %v5678_v63 = vadd.f32 %v5677_v60, %v5676_v58  ;;  %v5679_v0 = vpop.f32.mrb[2].mxu0  ;;  %5979 = vmatpush3.bf16.msra.mxu0 %v6529_v55  ;;  %v5699_v3 = vpop.f32.mrb[1].mxu1  ;;  %v7731_v55 = vrot.slane %v2791_v46, %v6916_v42 }
  0xfb   :  { %v5680_v4 = vpop.f32.mrb[3].mxu0  ;;  %5980 = vmatprep.subr.bf16.mxu0 %v6531_v57  ;;  %v5700_v5 = vadd.f32 %v5699_v3, %v5698_v62  ;;  %v5701_v6 = vpop.f32.mrb[2].mxu1  ;;  %v2828_v62 = vrot.slane %v2806_v54, %v6916_v42  ;;  %v2814_v3 = vrot.slane %v2798_v45, %v6916_v42  ;;  %v6606_v54 = vld [vmem:[%s8299_s2 + $0x4c0] sm:$0xff]  }
  0xfc   :  { %6001 = vmatpush3.bf16.msra.mxu1 %v6530_v56  ;;  %v5702_v8 = vpop.f32.mrb[3].mxu1  ;;  %v6572_v4 = vld [vmem:[%s8299_s2 + $0x340] sm:$0xff]  }
  0xfd   :  { %6002 = vmatprep.subr.bf16.mxu1 %v6532_v59  ;;  %v7632_v10 = vadd.f32 %v5700_v5, %v5678_v63  ;;  %v6569_v59 = vld [vmem:[%s8299_s2 + $0x2f8] sm:$0xff]   ;;  %v2807_v63 = vcombine.high %v7731_v55, %v7731_v55  ;;  %v6573_v5 = vld [vmem:[%s8299_s2 + $0x3c0] sm:$0xff]  }
  0xfe   :  { %5981 = vmatpush3.bf16.msra.mxu0 %v6533_v61  ;;  %v6570_v61 = vld [vmem:[%s8299_s2 + $0x238] sm:$0xff]   ;;  %v6575_v8 = vld [vmem:[%s8299_s2 + $0x380] sm:$0xff]  }
  0xff   :  { %5982 = vmatprep.subr.bf16.mxu0 %v6535_v2  ;;  %v2838_v2 = vcombine.high %v2828_v62, %v2828_v62  ;;  %v2835_v6 = vrot.slane %v2807_v63, %v6916_v42  ;;  %v6614_v63 = vld [vmem:[%s8299_s2 + $0x4d0] sm:$0xff]  }
 0x100   :  { %6003 = vmatpush3.bf16.msra.mxu1 %v6534_v1  ;;  %v6571_v1 = vld [vmem:[%s8299_s2 + $0x2b8] sm:$0xff]  }
 0x101   :  { %6004 = vmatprep.subr.bf16.mxu1 %v6536_v7  ;;  %v6574_v7 = vld [vmem:[%s8299_s2 + $0x300] sm:$0xff]  }
 0x102   :  { %5983 = vmatpush3.bf16.msra.mxu0 %v6537_v9  ;;  %v2836_v9 = vcombine.high %v2814_v3, %v2814_v3 }
 0x103   :  { %6012 = vmatprep.subr.bf16.mxu0 %v6540_v13  ;;  %v6578_v13 = vld [vmem:[%s8299_s2 + $0x308] sm:$0xff]  }
 0x104   :  { %6005 = vmatpush3.bf16.msra.mxu1 %v6538_v11  ;;  %v6577_v11 = vld [vmem:[%s8299_s2 + $0x3c8] sm:$0xff]  }
 0x105   :  { %4619 = vmatmul.mubr.bf16.vlgmr.msra.gmra.mrb[28].mxu0 %v2772_v12  ;;  %6034 = vmatprep.subr.bf16.mxu1 %v6541_v14  ;;  %v2839_v12 = vcombine.high %v2835_v6, %v2835_v6  ;;  %v6579_v14 = vld [vmem:[%s8299_s2 + $0x388] sm:$0xff]  }
 0x106   :  { %6013 = vmatpush3.bf16.msra.mxu0 %v6542_v15  ;;  %4698 = vmatprep.mubr.bf16.mxu0 %v2828_v62  ;;  %v6580_v15 = vld [vmem:[%s8299_s2 + $0x350] sm:$0xff]  }
 0x107   :  { %4659 = vmatmul.mubr.bf16.vlgmr.msra.gmra.mrb[28].mxu1 %v2788_v17  ;;  %6014 = vmatprep.subr.bf16.mxu0 %v6544_v18  ;;  %v6582_v17 = vld [vmem:[%s8299_s2 + $0x310] sm:$0xff]  }
 0x108   :  { %6035 = vmatpush3.bf16.msra.mxu1 %v6543_v16  ;;  %4738 = vmatprep.mubr.bf16.mxu1 %v2838_v2  ;;  %v6581_v16 = vld [vmem:[%s8299_s2 + $0x3d0] sm:$0xff]   ;;  %v6617_v2 = vld [vmem:[%s8299_s2 + $0x458] sm:$0xff]  }
 0x109   :  { %6036 = vmatprep.subr.bf16.mxu1 %v6545_v19  ;;  %v6583_v18 = vld [vmem:[%s8299_s2 + $0x390] sm:$0xff]   ;;  %v6584_v19 = vld [vmem:[%s8299_s2 + $0x358] sm:$0xff]  }
 0x10a   :  { %6015 = vmatpush3.bf16.msra.mxu0 %v6546_v20  ;;  %v6585_v20 = vld [vmem:[%s8299_s2 + $0x3d8] sm:$0xff]   ;;  %v6613_v62 = vld [vmem:[%s8299_s2 + $0x450] sm:$0xff]  }
 0x10b   :  { %6016 = vmatprep.subr.bf16.mxu0 %v6548_v22  ;;  %v6587_v22 = vld [vmem:[%s8299_s2 + $0x398] sm:$0xff]  }
 0x10c   :  { %6037 = vmatpush3.bf16.msra.mxu1 %v6547_v21  ;;  %v6586_v21 = vld [vmem:[%s8299_s2 + $0x318] sm:$0xff]  }
 0x10d   :  { %6038 = vmatprep.subr.bf16.mxu1 %v6549_v23  ;;  %v6588_v23 = vld [vmem:[%s8299_s2 + $0x360] sm:$0xff]  }
 0x10e   :  { %6017 = vmatpush3.bf16.msra.mxu0 %v6550_v24  ;;  %v6589_v24 = vld [vmem:[%s8299_s2 + $0x3e0] sm:$0xff]  }
 0x10f   :  { %6018 = vmatprep.subr.bf16.mxu0 %v6552_v26  ;;  %v6591_v26 = vld [vmem:[%s8299_s2 + $0x3a0] sm:$0xff]  }
 0x110   :  { %6039 = vmatpush3.bf16.msra.mxu1 %v6551_v25  ;;  %v6590_v25 = vld [vmem:[%s8299_s2 + $0x320] sm:$0xff]  }
 0x111   :  { %6040 = vmatprep.subr.bf16.mxu1 %v6553_v27  ;;  %v6592_v27 = vld [vmem:[%s8299_s2 + $0x368] sm:$0xff]  }
 0x112   :  { %6019 = vmatpush3.bf16.msra.mxu0 %v6554_v28  ;;  %v6593_v28 = vld [vmem:[%s8299_s2 + $0x3e8] sm:$0xff]  }
 0x113   :  { %6020 = vmatprep.subr.bf16.mxu0 %v6556_v30  ;;  %v6595_v30 = vld [vmem:[%s8299_s2 + $0x3a8] sm:$0xff]  }
 0x114   :  { %6041 = vmatpush3.bf16.msra.mxu1 %v6555_v29  ;;  %v6594_v29 = vld [vmem:[%s8299_s2 + $0x328] sm:$0xff]  }
 0x115   :  { %6042 = vmatprep.subr.bf16.mxu1 %v6557_v31  ;;  %v6596_v31 = vld [vmem:[%s8299_s2 + $0x370] sm:$0xff]  }
 0x116   :  { %6021 = vmatpush3.bf16.msra.mxu0 %v6558_v32 }
 0x117   :  { %6022 = vmatprep.subr.bf16.mxu0 %v6560_v34 }
 0x118   :  { %6043 = vmatpush3.bf16.msra.mxu1 %v6559_v33  ;;  %v5720_v39 = vpop.f32.mrb[4].mxu0  ;;  %v6597_v33 = vld [vmem:[%s8299_s2 + $0x3f0] sm:$0xff]  }
 0x119   :  { %v5721_v43 = vpop.f32.mrb[5].mxu0  ;;  %6044 = vmatprep.subr.bf16.mxu1 %v6561_v35  ;;  %v5742_v47 = vpop.f32.mrb[4].mxu1  ;;  %v6598_v35 = vld [vmem:[%s8299_s2 + $0x330] sm:$0xff]  }
 0x11a   :  { %v5722_v48 = vadd.f32 %v5721_v43, %v5720_v39  ;;  %v5723_v49 = vpop.f32.mrb[6].mxu0  ;;  %6023 = vmatpush3.bf16.msra.mxu0 %v6562_v36  ;;  %v5743_v50 = vpop.f32.mrb[5].mxu1  ;;  %v6599_v39 = vld [vmem:[%s8299_s2 + $0x3b0] sm:$0xff]  }
 0x11b   :  { %v5724_v51 = vpop.f32.mrb[7].mxu0  ;;  %6024 = vmatprep.subr.bf16.mxu0 %v6564_v38  ;;  %v5744_v57 = vadd.f32 %v5743_v50, %v5742_v47  ;;  %v5745_v58 = vpop.f32.mrb[6].mxu1  ;;  %v6601_v47 = vld [vmem:[%s8299_s2 + $0x3f8] sm:$0xff]  }
 0x11c   :  { %v2373_v56 = vadd.f32 %v5722_v48, %v7632_v10  ;;  %6045 = vmatpush3.bf16.msra.mxu1 %v6563_v37  ;;  %v5746_v60 = vpop.f32.mrb[7].mxu1  ;;  %v6576_v10 = vld [vmem:[%s8299_s2 + $0x348] sm:$0xff]   ;;  %v6602_v49 = vld [vmem:[%s8299_s2 + $0x338] sm:$0xff]  }
 0x11d   :  { %6046 = vmatprep.subr.bf16.mxu1 %v6565_v40  ;;  %v6600_v40 = vld [vmem:[%s8299_s2 + $0x378] sm:$0xff]   ;;  %v6609_v58 = vld [vmem:[%s8299_s2 + $0x448] sm:$0xff]  }
 0x11e   :  { %v7743_v0 = vadd.f32 %v5744_v57, %v2373_v56  ;;  %6025 = vmatpush3.bf16.msra.mxu0 %v6566_v44  ;;  %v6603_v51 = vld [vmem:[%s8299_s2 + $0x3b8] sm:$0xff]   ;;  %v6607_v56 = vld [vmem:[%s8299_s2 + $0x400] sm:$0xff]   ;;  %v6611_v60 = vld [vmem:[%s8299_s2 + $0x408] sm:$0xff]  }
 0x11f   :  { %6026 = vmatprep.subr.bf16.mxu0 %v6568_v53  ;;  %v6605_v53 = vld [vmem:[%s8299_s2 + $0x440] sm:$0xff]  }
 0x120   :  { %6047 = vmatpush3.bf16.msra.mxu1 %v6567_v52  ;;  %v2821_v52 = vrot.slane %v7731_v55, %v6916_v42  ;;  %v6608_v57 = vld [vmem:[%s8299_s2 + $0x480] sm:$0xff]  }
 0x121   :  { %6048 = vmatprep.subr.bf16.mxu1 %v6569_v59  ;;  %v6610_v59 = vld [vmem:[%s8299_s2 + $0x4c8] sm:$0xff]  }
 0x122   :  { %6027 = vmatpush3.bf16.msra.mxu0 %v6570_v61  ;;  %v2837_v55 = vcombine.high %v2821_v52, %v2821_v52  ;;  %v6612_v61 = vld [vmem:[%s8299_s2 + $0x488] sm:$0xff]  }
 0x123   :  { %6056 = vmatprep.subr.bf16.mxu0 %v6572_v4  ;;  %v6619_v4 = vld [vmem:[%s8299_s2 + $0x418] sm:$0xff]  }
 0x124   :  { %6049 = vmatpush3.bf16.msra.mxu1 %v6571_v1  ;;  %v6616_v1 = vld [vmem:[%s8299_s2 + $0x490] sm:$0xff]  }
 0x125   :  { %4699 = vmatmul.mubr.bf16.vlgmr.msra.gmra.mrb[32].mxu0 %v2814_v3  ;;  %6078 = vmatprep.subr.bf16.mxu1 %v6573_v5  ;;  %v6618_v3 = vld [vmem:[%s8299_s2 + $0x4d8] sm:$0xff]  }
 0x126   :  { %6057 = vmatpush3.bf16.msra.mxu0 %v6574_v7  ;;  %4778 = vmatprep.mubr.bf16.mxu0 %v2835_v6  ;;  %v6620_v5 = vld [vmem:[%s8299_s2 + $0x498] sm:$0xff]   ;;  %v6621_v6 = vld [vmem:[%s8299_s2 + $0x460] sm:$0xff]  }
 0x127   :  { %4739 = vmatmul.mubr.bf16.vlgmr.msra.gmra.mrb[32].mxu1 %v2836_v9  ;;  %6058 = vmatprep.subr.bf16.mxu0 %v6576_v10  ;;  %v6622_v7 = vld [vmem:[%s8299_s2 + $0x4e0] sm:$0xff]   ;;  %v6625_v10 = vld [vmem:[%s8299_s2 + $0x468] sm:$0xff]  }
 0x128   :  { %6079 = vmatpush3.bf16.msra.mxu1 %v6575_v8  ;;  %4818 = vmatprep.mubr.bf16.mxu1 %v2839_v12  ;;  %v6623_v8 = vld [vmem:[%s8299_s2 + $0x420] sm:$0xff]   ;;  %v6627_v12 = vld [vmem:[%s8299_s2 + $0x428] sm:$0xff]  }
 0x129   :  { %6080 = vmatprep.subr.bf16.mxu1 %v6577_v11  ;;  %v6624_v9 = vld [vmem:[%s8299_s2 + $0x4a0] sm:$0xff]   ;;  %v6626_v11 = vld [vmem:[%s8299_s2 + $0x4e8] sm:$0xff]  }
 0x12a   :  { %6059 = vmatpush3.bf16.msra.mxu0 %v6578_v13  ;;  %v6628_v13 = vld [vmem:[%s8299_s2 + $0x4a8] sm:$0xff]  }
 0x12b   :  { %6060 = vmatprep.subr.bf16.mxu0 %v6580_v15 }
 0x12c   :  { %6081 = vmatpush3.bf16.msra.mxu1 %v6579_v14  ;;  %v6629_v14 = vld [vmem:[%s8299_s2 + $0x470] sm:$0xff]  }
 0x12d   :  { %6082 = vmatprep.subr.bf16.mxu1 %v6581_v16  ;;  %v6630_v16 = vld [vmem:[%s8299_s2 + $0x4f0] sm:$0xff]  }
 0x12e   :  { %6061 = vmatpush3.bf16.msra.mxu0 %v6582_v17 }
 0x12f   :  { %6062 = vmatprep.subr.bf16.mxu0 %v6584_v19  ;;  %v31_v19 = vld [vmem:[%s8297_s0 + $0x10] sm:$0xff] }
 0x130   :  { %6083 = vmatpush3.bf16.msra.mxu1 %v6583_v18  ;;  %v6631_v18 = vld [vmem:[%s8299_s2 + $0x430] sm:$0xff]  }
 0x131   :  { %6084 = vmatprep.subr.bf16.mxu1 %v6585_v20 }
 0x132   :  { %6063 = vmatpush3.bf16.msra.mxu0 %v6586_v21 }
 0x133   :  { %6064 = vmatprep.subr.bf16.mxu0 %v6588_v23  ;;  %v2847_v23 = vrot.slane %v31_v19, %v6916_v42 }
 0x134   :  { %6085 = vmatpush3.bf16.msra.mxu1 %v6587_v22 }
 0x135   :  { %6086 = vmatprep.subr.bf16.mxu1 %v6589_v24  ;;  %v2840_v24 = vcombine.high %v31_v19, %v31_v19 }
 0x136   :  { %6065 = vmatpush3.bf16.msra.mxu0 %v6590_v25 }
 0x137   :  { %6066 = vmatprep.subr.bf16.mxu0 %v6592_v27  ;;  %v6632_v27 = vld [vmem:[%s8299_s2 + $0x4b0] sm:$0xff]  }
 0x138   :  { %6087 = vmatpush3.bf16.msra.mxu1 %v6591_v26  ;;  %v5764_v32 = vpop.f32.mrb[8].mxu0 }
 0x139   :  { %v5765_v34 = vpop.f32.mrb[9].mxu0  ;;  %6088 = vmatprep.subr.bf16.mxu1 %v6593_v28  ;;  %v6633_v28 = vld [vmem:[%s8299_s2 + $0x478] sm:$0xff]  }
 0x13a   :  { %v5786_v36 = vpop.f32.mrb[8].mxu1  ;;  %v5766_v37 = vadd.f32 %v5765_v34, %v5764_v32  ;;  %v5767_v38 = vpop.f32.mrb[10].mxu0  ;;  %6067 = vmatpush3.bf16.msra.mxu0 %v6594_v29  ;;  %v6634_v32 = vld [vmem:[%s8299_s2 + $0x4f8] sm:$0xff]  }
 0x13b   :  { %v5787_v41 = vpop.f32.mrb[9].mxu1  ;;  %v5768_v43 = vpop.f32.mrb[11].mxu0  ;;  %6068 = vmatprep.subr.bf16.mxu0 %v6596_v31  ;;  %v6636_v38 = vld [vmem:[%s8299_s2 + $0x4b8] sm:$0xff]  }
 0x13c   :  { %v2453_v44 = vadd.f32 %v5766_v37, %v7743_v0  ;;  %v5788_v45 = vadd.f32 %v5787_v41, %v5786_v36  ;;  %v5789_v46 = vpop.f32.mrb[10].mxu1  ;;  %6089 = vmatpush3.bf16.msra.mxu1 %v6595_v30  ;;  %v6615_v0 = vld [vmem:[%s8299_s2 + $0x410] sm:$0xff]   ;;  %v7950_v36 = vrot.slane %v2840_v24, %v6916_v42  ;;  %v6637_v41 = vld [vmem:[%s8299_s2 + $0x540] sm:$0xff]   ;;  %v6667_v24 = vld [vmem:[%s8299_s2 + $0x538] sm:$0xff]  }
 0x13d   :  { %v5790_v48 = vpop.f32.mrb[11].mxu1  ;;  %6090 = vmatprep.subr.bf16.mxu1 %v6597_v33  ;;  %v2855_v33 = vcombine.high %v2847_v23, %v2847_v23  ;;  %v6639_v46 = vld [vmem:[%s8299_s2 + $0x500] sm:$0xff]  }
 0x13e   :  { %v7844_v50 = vadd.f32 %v5788_v45, %v2453_v44  ;;  %6069 = vmatpush3.bf16.msra.mxu0 %v6598_v35  ;;  %v6635_v35 = vld [vmem:[%s8299_s2 + $0x438] sm:$0xff]   ;;  %v2856_v43 = vcombine.high %v7950_v36, %v7950_v36  ;;  %v6638_v45 = vld [vmem:[%s8299_s2 + $0x5c0] sm:$0xff]  }
 0x13f   :  { %6070 = vmatprep.subr.bf16.mxu0 %v6600_v40  ;;  %v2863_v40 = vrot.slane %v2847_v23, %v6916_v42  ;;  %v6640_v48 = vld [vmem:[%s8299_s2 + $0x580] sm:$0xff]  }
 0x140   :  { %6091 = vmatpush3.bf16.msra.mxu1 %v6599_v39  ;;  %v2877_v39 = vrot.slane %v2855_v33, %v6916_v42  ;;  %v6674_v33 = vld [vmem:[%s8299_s2 + $0x648] sm:$0xff]  }
 0x141   :  { %6092 = vmatprep.subr.bf16.mxu1 %v6601_v47  ;;  %v2884_v47 = vrot.slane %v2856_v43, %v6916_v42  ;;  %v6683_v43 = vld [vmem:[%s8299_s2 + $0x6d8] sm:$0xff]  }
 0x142   :  { %6071 = vmatpush3.bf16.msra.mxu0 %v6602_v49  ;;  %v2887_v44 = vcombine.high %v2877_v39, %v2877_v39  ;;  %v2885_v49 = vcombine.high %v2863_v40, %v2863_v40 }
 0x143   :  { %6100 = vmatprep.subr.bf16.mxu0 %v6605_v53  ;;  %v6643_v53 = vld [vmem:[%s8299_s2 + $0x508] sm:$0xff]  }
 0x144   :  { %6093 = vmatpush3.bf16.msra.mxu1 %v6603_v51  ;;  %v6642_v51 = vld [vmem:[%s8299_s2 + $0x5c8] sm:$0xff]  }
 0x145   :  { %4779 = vmatmul.mubr.bf16.vlgmr.msra.gmra.mrb[36].mxu0 %v2821_v52  ;;  %6122 = vmatprep.subr.bf16.mxu1 %v6606_v54  ;;  %v2888_v52 = vcombine.high %v2884_v47, %v2884_v47  ;;  %v6644_v54 = vld [vmem:[%s8299_s2 + $0x588] sm:$0xff]  }
 0x146   :  { %6101 = vmatpush3.bf16.msra.mxu0 %v6607_v56  ;;  %4858 = vmatprep.mubr.bf16.mxu0 %v2877_v39  ;;  %v6645_v56 = vld [vmem:[%s8299_s2 + $0x550] sm:$0xff]  }
 0x147   :  { %4819 = vmatmul.mubr.bf16.vlgmr.msra.gmra.mrb[36].mxu1 %v2837_v55  ;;  %6102 = vmatprep.subr.bf16.mxu0 %v6609_v58  ;;  %v6647_v55 = vld [vmem:[%s8299_s2 + $0x510] sm:$0xff]  }
 0x148   :  { %6123 = vmatpush3.bf16.msra.mxu1 %v6608_v57  ;;  %4898 = vmatprep.mubr.bf16.mxu1 %v2887_v44  ;;  %v6646_v57 = vld [vmem:[%s8299_s2 + $0x5d0] sm:$0xff]   ;;  %v6684_v44 = vld [vmem:[%s8299_s2 + $0x618] sm:$0xff]  }
 0x149   :  { %6124 = vmatprep.subr.bf16.mxu1 %v6610_v59  ;;  %v6648_v58 = vld [vmem:[%s8299_s2 + $0x590] sm:$0xff]   ;;  %v6649_v59 = vld [vmem:[%s8299_s2 + $0x558] sm:$0xff]  }
 0x14a   :  { %6103 = vmatpush3.bf16.msra.mxu0 %v6611_v60  ;;  %v6650_v60 = vld [vmem:[%s8299_s2 + $0x5d8] sm:$0xff]   ;;  %v6680_v39 = vld [vmem:[%s8299_s2 + $0x610] sm:$0xff]  }
 0x14b   :  { %6104 = vmatprep.subr.bf16.mxu0 %v6613_v62  ;;  %v6652_v62 = vld [vmem:[%s8299_s2 + $0x598] sm:$0xff]  }
 0x14c   :  { %6125 = vmatpush3.bf16.msra.mxu1 %v6612_v61  ;;  %v6651_v61 = vld [vmem:[%s8299_s2 + $0x518] sm:$0xff]  }
 0x14d   :  { %6126 = vmatprep.subr.bf16.mxu1 %v6614_v63  ;;  %v6653_v63 = vld [vmem:[%s8299_s2 + $0x560] sm:$0xff]  }
 0x14e   :  { %6105 = vmatpush3.bf16.msra.mxu0 %v6615_v0  ;;  %v6654_v0 = vld [vmem:[%s8299_s2 + $0x5e0] sm:$0xff]  }
 0x14f   :  { %6106 = vmatprep.subr.bf16.mxu0 %v6617_v2  ;;  %v6656_v2 = vld [vmem:[%s8299_s2 + $0x5a0] sm:$0xff]  }
 0x150   :  { %6127 = vmatpush3.bf16.msra.mxu1 %v6616_v1  ;;  %v6655_v1 = vld [vmem:[%s8299_s2 + $0x520] sm:$0xff]  }
 0x151   :  { %6128 = vmatprep.subr.bf16.mxu1 %v6618_v3  ;;  %v6657_v3 = vld [vmem:[%s8299_s2 + $0x568] sm:$0xff]  }
 0x152   :  { %6107 = vmatpush3.bf16.msra.mxu0 %v6619_v4  ;;  %v6658_v4 = vld [vmem:[%s8299_s2 + $0x5e8] sm:$0xff]  }
 0x153   :  { %6108 = vmatprep.subr.bf16.mxu0 %v6621_v6  ;;  %v6660_v6 = vld [vmem:[%s8299_s2 + $0x5a8] sm:$0xff]  }
 0x154   :  { %6129 = vmatpush3.bf16.msra.mxu1 %v6620_v5  ;;  %v6659_v5 = vld [vmem:[%s8299_s2 + $0x528] sm:$0xff]  }
 0x155   :  { %6130 = vmatprep.subr.bf16.mxu1 %v6622_v7  ;;  %v6661_v7 = vld [vmem:[%s8299_s2 + $0x570] sm:$0xff]  }
 0x156   :  { %6109 = vmatpush3.bf16.msra.mxu0 %v6623_v8 }
 0x157   :  { %6110 = vmatprep.subr.bf16.mxu0 %v6625_v10 }
 0x158   :  { %6131 = vmatpush3.bf16.msra.mxu1 %v6624_v9  ;;  %v5808_v15 = vpop.f32.mrb[12].mxu0  ;;  %v6662_v9 = vld [vmem:[%s8299_s2 + $0x5f0] sm:$0xff]  }
 0x159   :  { %v5809_v17 = vpop.f32.mrb[13].mxu0  ;;  %6132 = vmatprep.subr.bf16.mxu1 %v6626_v11  ;;  %v6663_v11 = vld [vmem:[%s8299_s2 + $0x530] sm:$0xff]  }
 0x15a   :  { %v5830_v20 = vpop.f32.mrb[12].mxu1  ;;  %v5810_v21 = vadd.f32 %v5809_v17, %v5808_v15  ;;  %v5811_v22 = vpop.f32.mrb[14].mxu0  ;;  %6111 = vmatpush3.bf16.msra.mxu0 %v6627_v12  ;;  %v6664_v15 = vld [vmem:[%s8299_s2 + $0x5b0] sm:$0xff]  }
 0x15b   :  { %v5831_v25 = vpop.f32.mrb[13].mxu1  ;;  %v5812_v26 = vpop.f32.mrb[15].mxu0  ;;  %6112 = vmatprep.subr.bf16.mxu0 %v6629_v14  ;;  %v6666_v22 = vld [vmem:[%s8299_s2 + $0x5f8] sm:$0xff]  }
 0x15c   :  { %v2533_v29 = vadd.f32 %v5810_v21, %v7844_v50  ;;  %v5832_v30 = vadd.f32 %v5831_v25, %v5830_v20  ;;  %v5833_v31 = vpop.f32.mrb[14].mxu1  ;;  %6133 = vmatpush3.bf16.msra.mxu1 %v6628_v13  ;;  %v6641_v50 = vld [vmem:[%s8299_s2 + $0x548] sm:$0xff]   ;;  %v6668_v26 = vld [vmem:[%s8299_s2 + $0x5b8] sm:$0xff]  }
 0x15d   :  { %v5834_v34 = vpop.f32.mrb[15].mxu1  ;;  %6134 = vmatprep.subr.bf16.mxu1 %v6630_v16  ;;  %v6665_v16 = vld [vmem:[%s8299_s2 + $0x578] sm:$0xff]   ;;  %v6673_v31 = vld [vmem:[%s8299_s2 + $0x680] sm:$0xff]  }
 0x15e   :  { %v7952_v37 = vadd.f32 %v5832_v30, %v2533_v29  ;;  %6113 = vmatpush3.bf16.msra.mxu0 %v6631_v18  ;;  %v6671_v29 = vld [vmem:[%s8299_s2 + $0x6c0] sm:$0xff]   ;;  %v6675_v34 = vld [vmem:[%s8299_s2 + $0x6c8] sm:$0xff]  }
 0x15f   :  { %6114 = vmatprep.subr.bf16.mxu0 %v6633_v28  ;;  %v6670_v28 = vld [vmem:[%s8299_s2 + $0x640] sm:$0xff]  }
 0x160   :  { %6135 = vmatpush3.bf16.msra.mxu1 %v6632_v27  ;;  %v2870_v27 = vrot.slane %v7950_v36, %v6916_v42  ;;  %v6672_v30 = vld [vmem:[%s8299_s2 + $0x600] sm:$0xff]   ;;  %v6677_v36 = vld [vmem:[%s8299_s2 + $0x688] sm:$0xff]  }
 0x161   :  { %6136 = vmatprep.subr.bf16.mxu1 %v6634_v32 }
 0x162   :  { %6115 = vmatpush3.bf16.msra.mxu0 %v6635_v35  ;;  %v2886_v32 = vcombine.high %v2870_v27, %v2870_v27  ;;  %v6676_v35 = vld [vmem:[%s8299_s2 + $0x608] sm:$0xff]  }
 0x163   :  { %6144 = vmatprep.subr.bf16.mxu0 %v6637_v41  ;;  %v6682_v41 = vld [vmem:[%s8299_s2 + $0x658] sm:$0xff]  }
 0x164   :  { %6137 = vmatpush3.bf16.msra.mxu1 %v6636_v38  ;;  %v6679_v38 = vld [vmem:[%s8299_s2 + $0x6d0] sm:$0xff]  }
 0x165   :  { %4859 = vmatmul.mubr.bf16.vlgmr.msra.gmra.mrb[40].mxu0 %v2863_v40  ;;  %6166 = vmatprep.subr.bf16.mxu1 %v6638_v45  ;;  %v6681_v40 = vld [vmem:[%s8299_s2 + $0x690] sm:$0xff]   ;;  %v6685_v45 = vld [vmem:[%s8299_s2 + $0x698] sm:$0xff]  }
 0x166   :  { %6145 = vmatpush3.bf16.msra.mxu0 %v6639_v46  ;;  %4938 = vmatprep.mubr.bf16.mxu0 %v2884_v47  ;;  %v6686_v46 = vld [vmem:[%s8299_s2 + $0x660] sm:$0xff]  }
 0x167   :  { %4899 = vmatmul.mubr.bf16.vlgmr.msra.gmra.mrb[40].mxu1 %v2885_v49  ;;  %6146 = vmatprep.subr.bf16.mxu0 %v6641_v50  ;;  %v6687_v47 = vld [vmem:[%s8299_s2 + $0x6e0] sm:$0xff]   ;;  %v6690_v50 = vld [vmem:[%s8299_s2 + $0x668] sm:$0xff]  }
 0x168   :  { %6167 = vmatpush3.bf16.msra.mxu1 %v6640_v48  ;;  %4978 = vmatprep.mubr.bf16.mxu1 %v2888_v52  ;;  %v6688_v48 = vld [vmem:[%s8299_s2 + $0x620] sm:$0xff]   ;;  %v6692_v52 = vld [vmem:[%s8299_s2 + $0x628] sm:$0xff]  }
 0x169   :  { %6168 = vmatprep.subr.bf16.mxu1 %v6642_v51  ;;  %v6689_v49 = vld [vmem:[%s8299_s2 + $0x6a0] sm:$0xff]   ;;  %v6691_v51 = vld [vmem:[%s8299_s2 + $0x6e8] sm:$0xff]  }
 0x16a   :  { %6147 = vmatpush3.bf16.msra.mxu0 %v6643_v53  ;;  %v6693_v53 = vld [vmem:[%s8299_s2 + $0x6a8] sm:$0xff]  }
 0x16b   :  { %6148 = vmatprep.subr.bf16.mxu0 %v6645_v56 }
 0x16c   :  { %6169 = vmatpush3.bf16.msra.mxu1 %v6644_v54  ;;  %v6694_v54 = vld [vmem:[%s8299_s2 + $0x670] sm:$0xff]  }
 0x16d   :  { %6170 = vmatprep.subr.bf16.mxu1 %v6646_v57  ;;  %v6695_v57 = vld [vmem:[%s8299_s2 + $0x6f0] sm:$0xff]  }
 0x16e   :  { %6149 = vmatpush3.bf16.msra.mxu0 %v6647_v55 }
 0x16f   :  { %6150 = vmatprep.subr.bf16.mxu0 %v6649_v59 }
 0x170   :  { %6171 = vmatpush3.bf16.msra.mxu1 %v6648_v58  ;;  %v6696_v58 = vld [vmem:[%s8299_s2 + $0x630] sm:$0xff]  }
 0x171   :  { %6172 = vmatprep.subr.bf16.mxu1 %v6650_v60 }
 0x172   :  { %6151 = vmatpush3.bf16.msra.mxu0 %v6651_v61 }
 0x173   :  { %6152 = vmatprep.subr.bf16.mxu0 %v6653_v63  ;;  %v32_v63 = vld [vmem:[%s8297_s0 + $0x18] sm:$0xff] }
 0x174   :  { %6173 = vmatpush3.bf16.msra.mxu1 %v6652_v62  ;;  %v6698_v62 = vld [vmem:[%s8299_s2 + $0x678] sm:$0xff]  }
 0x175   :  { %6174 = vmatprep.subr.bf16.mxu1 %v6654_v0 }
 0x176   :  { %6153 = vmatpush3.bf16.msra.mxu0 %v6655_v1 }
 0x177   :  { %6154 = vmatprep.subr.bf16.mxu0 %v6657_v3  ;;  %v2889_v3 = vcombine.high %v32_v63, %v32_v63 }
 0x178   :  { %6175 = vmatpush3.bf16.msra.mxu1 %v6656_v2  ;;  %v5852_v8 = vpop.f32.mrb[16].mxu0  ;;  %v2896_v2 = vrot.slane %v32_v63, %v6916_v42  ;;  %v6729_v63 = vld [vmem:[%s8299_s2 + $0x7b0] sm:$0xff]  }
 0x179   :  { %v5853_v10 = vpop.f32.mrb[17].mxu0  ;;  %6176 = vmatprep.subr.bf16.mxu1 %v6658_v4 }
 0x17a   :  { %v5874_v12 = vpop.f32.mrb[16].mxu1  ;;  %v5854_v13 = vadd.f32 %v5853_v10, %v5852_v8  ;;  %v5855_v14 = vpop.f32.mrb[18].mxu0  ;;  %6155 = vmatpush3.bf16.msra.mxu0 %v6659_v5  ;;  %v2904_v10 = vcombine.high %v2896_v2, %v2896_v2 }
 0x17b   :  { %v5875_v17 = vpop.f32.mrb[17].mxu1  ;;  %v5856_v18 = vpop.f32.mrb[19].mxu0  ;;  %6156 = vmatprep.subr.bf16.mxu0 %v6661_v7  ;;  %v6697_v7 = vld [vmem:[%s8299_s2 + $0x6b0] sm:$0xff]  }
 0x17c   :  { %v2613_v19 = vadd.f32 %v5854_v13, %v7952_v37  ;;  %v5876_v20 = vadd.f32 %v5875_v17, %v5874_v12  ;;  %v5877_v21 = vpop.f32.mrb[18].mxu1  ;;  %6177 = vmatpush3.bf16.msra.mxu1 %v6660_v6  ;;  %v6678_v37 = vld [vmem:[%s8299_s2 + $0x650] sm:$0xff]   ;;  %v6700_v13 = vld [vmem:[%s8299_s2 + $0x638] sm:$0xff]   ;;  %v2926_v14 = vrot.slane %v2904_v10, %v6916_v42 }
 0x17d   :  { %v5878_v23 = vpop.f32.mrb[19].mxu1  ;;  %6178 = vmatprep.subr.bf16.mxu1 %v6662_v9  ;;  %v6699_v9 = vld [vmem:[%s8299_s2 + $0x6f8] sm:$0xff]   ;;  %v6703_v21 = vld [vmem:[%s8299_s2 + $0x7c0] sm:$0xff]  }
 0x17e   :  { %v8056_v25 = vadd.f32 %v5876_v20, %v2613_v19  ;;  %6157 = vmatpush3.bf16.msra.mxu0 %v6663_v11  ;;  %v8159_v11 = vrot.slane %v2889_v3, %v6916_v42  ;;  %v6701_v18 = vld [vmem:[%s8299_s2 + $0x6b8] sm:$0xff]   ;;  %v6766_v19 = vmov 0   ;;  %v2936_v20 = vcombine.high %v2926_v14, %v2926_v14  ;;  %v6704_v23 = vld [vmem:[%s8299_s2 + $0x700] sm:$0xff]  }
 0x17f   :  { %6158 = vmatprep.subr.bf16.mxu0 %v6665_v16  ;;  %v6702_v16 = vld [vmem:[%s8299_s2 + $0x740] sm:$0xff]   ;;  %6279 = vset.pattern.permute.xlu0 %v6766_v19 }
 0x180   :  { %6179 = vmatpush3.bf16.msra.mxu1 %v6664_v15  ;;  %v2912_v15 = vrot.slane %v2896_v2, %v6916_v42  ;;  %v2905_v17 = vcombine.high %v8159_v11, %v8159_v11 }
 0x181   :  { %6180 = vmatprep.subr.bf16.mxu1 %v6666_v22 }
 0x182   :  { %6159 = vmatpush3.bf16.msra.mxu0 %v6667_v24  ;;  %v2933_v22 = vrot.slane %v2905_v17, %v6916_v42  ;;  %v2934_v24 = vcombine.high %v2912_v15, %v2912_v15 }
 0x183   :  { %6188 = vmatprep.subr.bf16.mxu0 %v6670_v28  ;;  %v6707_v28 = vld [vmem:[%s8299_s2 + $0x7c8] sm:$0xff]  }
 0x184   :  { %6181 = vmatpush3.bf16.msra.mxu1 %v6668_v26  ;;  %v6705_v26 = vld [vmem:[%s8299_s2 + $0x780] sm:$0xff]  }
 0x185   :  { %4939 = vmatmul.mubr.bf16.vlgmr.msra.gmra.mrb[44].mxu0 %v2870_v27  ;;  %6210 = vmatprep.subr.bf16.mxu1 %v6671_v29  ;;  %v2937_v27 = vcombine.high %v2933_v22, %v2933_v22  ;;  %v6708_v29 = vld [vmem:[%s8299_s2 + $0x708] sm:$0xff]  }
 0x186   :  { %6189 = vmatpush3.bf16.msra.mxu0 %v6672_v30  ;;  %5018 = vmatprep.mubr.bf16.mxu0 %v2926_v14  ;;  %v6710_v30 = vld [vmem:[%s8299_s2 + $0x750] sm:$0xff]  }
 0x187   :  { %4979 = vmatmul.mubr.bf16.vlgmr.msra.gmra.mrb[44].mxu1 %v2886_v32  ;;  %6190 = vmatprep.subr.bf16.mxu0 %v6674_v33  ;;  %v6711_v32 = vld [vmem:[%s8299_s2 + $0x7d0] sm:$0xff]  }
 0x188   :  { %6211 = vmatpush3.bf16.msra.mxu1 %v6673_v31  ;;  %5058 = vmatprep.mubr.bf16.mxu1 %v2936_v20  ;;  %v6709_v31 = vld [vmem:[%s8299_s2 + $0x788] sm:$0xff]   ;;  %v6712_v33 = vld [vmem:[%s8299_s2 + $0x710] sm:$0xff]  }
 0x189   :  { %6212 = vmatprep.subr.bf16.mxu1 %v6675_v34  ;;  %v6714_v34 = vld [vmem:[%s8299_s2 + $0x758] sm:$0xff]  }
 0x18a   :  { %6191 = vmatpush3.bf16.msra.mxu0 %v6676_v35  ;;  %v6713_v35 = vld [vmem:[%s8299_s2 + $0x790] sm:$0xff]  }
 0x18b   :  { %6192 = vmatprep.subr.bf16.mxu0 %v6678_v37  ;;  %v6716_v37 = vld [vmem:[%s8299_s2 + $0x718] sm:$0xff]  }
 0x18c   :  { %6213 = vmatpush3.bf16.msra.mxu1 %v6677_v36  ;;  %v6715_v36 = vld [vmem:[%s8299_s2 + $0x7d8] sm:$0xff]  }
 0x18d   :  { %6214 = vmatprep.subr.bf16.mxu1 %v6679_v38  ;;  %v6718_v38 = vld [vmem:[%s8299_s2 + $0x760] sm:$0xff]  }
 0x18e   :  { %6193 = vmatpush3.bf16.msra.mxu0 %v6680_v39  ;;  %v6717_v39 = vld [vmem:[%s8299_s2 + $0x798] sm:$0xff]  }
 0x18f   :  { %6194 = vmatprep.subr.bf16.mxu0 %v6682_v41  ;;  %v6720_v41 = vld [vmem:[%s8299_s2 + $0x720] sm:$0xff]  }
 0x190   :  { %6215 = vmatpush3.bf16.msra.mxu1 %v6681_v40  ;;  %v6719_v40 = vld [vmem:[%s8299_s2 + $0x7e0] sm:$0xff]  }
 0x191   :  { %6216 = vmatprep.subr.bf16.mxu1 %v6683_v43  ;;  %v6722_v43 = vld [vmem:[%s8299_s2 + $0x768] sm:$0xff]  }
 0x192   :  { %6195 = vmatpush3.bf16.msra.mxu0 %v6684_v44  ;;  %v6721_v44 = vld [vmem:[%s8299_s2 + $0x7a0] sm:$0xff]  }
 0x193   :  { %6196 = vmatprep.subr.bf16.mxu0 %v6686_v46  ;;  %v6724_v46 = vld [vmem:[%s8299_s2 + $0x728] sm:$0xff]  }
 0x194   :  { %6217 = vmatpush3.bf16.msra.mxu1 %v6685_v45  ;;  %v6723_v45 = vld [vmem:[%s8299_s2 + $0x7e8] sm:$0xff]  }
 0x195   :  { %6218 = vmatprep.subr.bf16.mxu1 %v6687_v47  ;;  %v6726_v47 = vld [vmem:[%s8299_s2 + $0x770] sm:$0xff]  }
 0x196   :  { %6197 = vmatpush3.bf16.msra.mxu0 %v6688_v48 }
 0x197   :  { %6198 = vmatprep.subr.bf16.mxu0 %v6690_v50 }
 0x198   :  { %6219 = vmatpush3.bf16.msra.mxu1 %v6689_v49  ;;  %v5896_v56 = vpop.f32.mrb[20].mxu0  ;;  %v6725_v49 = vld [vmem:[%s8299_s2 + $0x7a8] sm:$0xff]  }
 0x199   :  { %v5897_v55 = vpop.f32.mrb[21].mxu0  ;;  %6220 = vmatprep.subr.bf16.mxu1 %v6691_v51  ;;  %v6727_v51 = vld [vmem:[%s8299_s2 + $0x7f0] sm:$0xff]  }
 0x19a   :  { %v5918_v59 = vpop.f32.mrb[20].mxu1  ;;  %v5898_v60 = vadd.f32 %v5897_v55, %v5896_v56  ;;  %v5899_v61 = vpop.f32.mrb[22].mxu0  ;;  %6199 = vmatpush3.bf16.msra.mxu0 %v6692_v52  ;;  %v6728_v56 = vld [vmem:[%s8299_s2 + $0x730] sm:$0xff]  }
 0x19b   :  { %v5919_v0 = vpop.f32.mrb[21].mxu1  ;;  %v5900_v1 = vpop.f32.mrb[23].mxu0  ;;  %6200 = vmatprep.subr.bf16.mxu0 %v6694_v54 }
 0x19c   :  { %v2693_v4 = vadd.f32 %v5898_v60, %v8056_v25  ;;  %v5920_v5 = vadd.f32 %v5919_v0, %v5918_v59  ;;  %v5921_v6 = vpop.f32.mrb[22].mxu1  ;;  %6221 = vmatpush3.bf16.msra.mxu1 %v6693_v53  ;;  %v6706_v25 = vld [vmem:[%s8299_s2 + $0x748] sm:$0xff]   ;;  %v5659_v59 = vld [vmem:[#allocation2] ss:$0 sm:$0xff] }
 0x19d   :  { %v5922_v8 = vpop.f32.mrb[23].mxu1  ;;  %6222 = vmatprep.subr.bf16.mxu1 %v6695_v57  ;;  %v6730_v57 = vld [vmem:[%s8299_s2 + $0x778] sm:$0xff]   ;;  %5153 = vperm.xlu0 %6279, %v5659_v59  }
 0x19e   :  { %v8161_v12 = vadd.f32 %v5920_v5, %v2693_v4  ;;  %6201 = vmatpush3.bf16.msra.mxu0 %v6696_v58 }
 0x19f   :  { %6202 = vmatprep.subr.bf16.mxu0 %v6698_v62 }
 0x1a0   :  { %6223 = vmatpush3.bf16.msra.mxu1 %v6697_v7 }
 0x1a1   :  { %6224 = vmatprep.subr.bf16.mxu1 %v6699_v9 }
 0x1a2   :  { %6203 = vmatpush3.bf16.msra.mxu0 %v6700_v13 }
 0x1a3   :  { %6232 = vmatprep.subr.bf16.mxu0 %v6702_v16 }
 0x1a4   :  { %6225 = vmatpush3.bf16.msra.mxu1 %v6701_v18 }
 0x1a5   :  { %5019 = vmatmul.mubr.bf16.vlgmr.msra.gmra.mrb[48].mxu0 %v2912_v15  ;;  %6254 = vmatprep.subr.bf16.mxu1 %v6703_v21 }
 0x1a6   :  { %6233 = vmatpush3.bf16.msra.mxu0 %v6704_v23  ;;  %5098 = vmatprep.mubr.bf16.mxu0 %v2933_v22 }
 0x1a7   :  { %5059 = vmatmul.mubr.bf16.vlgmr.msra.gmra.mrb[48].mxu1 %v2934_v24  ;;  %6234 = vmatprep.subr.bf16.mxu0 %v6706_v25 }
 0x1a8   :  { %6255 = vmatpush3.bf16.msra.mxu1 %v6705_v26  ;;  %5138 = vmatprep.mubr.bf16.mxu1 %v2937_v27 }
 0x1a9   :  { %6256 = vmatprep.subr.bf16.mxu1 %v6707_v28 }
 0x1aa   :  { %6235 = vmatpush3.bf16.msra.mxu0 %v6708_v29 }
 0x1ab   :  { %6236 = vmatprep.subr.bf16.mxu0 %v6710_v30 }
 0x1ac   :  { %6257 = vmatpush3.bf16.msra.mxu1 %v6709_v31 }
 0x1ad   :  { %6258 = vmatprep.subr.bf16.mxu1 %v6711_v32 }
 0x1ae   :  { %6237 = vmatpush3.bf16.msra.mxu0 %v6712_v33 }
 0x1af   :  { %6238 = vmatprep.subr.bf16.mxu0 %v6714_v34 }
 0x1b0   :  { %6259 = vmatpush3.bf16.msra.mxu1 %v6713_v35 }
 0x1b1   :  { %6260 = vmatprep.subr.bf16.mxu1 %v6715_v36 }
 0x1b2   :  { %6239 = vmatpush3.bf16.msra.mxu0 %v6716_v37 }
 0x1b3   :  { %6240 = vmatprep.subr.bf16.mxu0 %v6718_v38 }
 0x1b4   :  { %6261 = vmatpush3.bf16.msra.mxu1 %v6717_v39 }
 0x1b5   :  { %6262 = vmatprep.subr.bf16.mxu1 %v6719_v40 }
 0x1b6   :  { %6241 = vmatpush3.bf16.msra.mxu0 %v6720_v41 }
 0x1b7   :  { %6242 = vmatprep.subr.bf16.mxu0 %v6722_v43 }
 0x1b8   :  { %6263 = vmatpush3.bf16.msra.mxu1 %v6721_v44  ;;  %v5940_v48 = vpop.f32.mrb[24].mxu0 }
 0x1b9   :  { %v5941_v50 = vpop.f32.mrb[25].mxu0  ;;  %6264 = vmatprep.subr.bf16.mxu1 %v6723_v45 }
 0x1ba   :  { %v5962_v52 = vpop.f32.mrb[24].mxu1  ;;  %v5942_v53 = vadd.f32 %v5941_v50, %v5940_v48  ;;  %v5943_v54 = vpop.f32.mrb[26].mxu0  ;;  %6243 = vmatpush3.bf16.msra.mxu0 %v6724_v46 }
 0x1bb   :  { %v5963_v55 = vpop.f32.mrb[25].mxu1  ;;  %v5944_v58 = vpop.f32.mrb[27].mxu0  ;;  %6244 = vmatprep.subr.bf16.mxu0 %v6726_v47 }
 0x1bc   :  { %v4541_v60 = vadd.f32 %v5942_v53, %v8161_v12  ;;  %v5964_v61 = vadd.f32 %v5963_v55, %v5962_v52  ;;  %v5965_v62 = vpop.f32.mrb[26].mxu1  ;;  %6265 = vmatpush3.bf16.msra.mxu1 %v6725_v49 }
 0x1bd   :  { %15 = vsyncpa [#allocation4], 0  ;;  %v5966_v0 = vpop.f32.mrb[27].mxu1  ;;  %6266 = vmatprep.subr.bf16.mxu1 %v6727_v51  ;;  %v6731_v1 = vld [vmem:[%s8299_s2 + $0x7f8] sm:$0xff]   ;;  %v2919_v4 = vrot.slane %v8159_v11, %v6916_v42  ;;  %vm5157_vm0 = vcmask 25600  }
 0x1be   :  { %v4581_v2 = vadd.f32 %v5964_v61, %v4541_v60  ;;  %6245 = vmatpush3.bf16.msra.mxu0 %v6728_v56  ;;  %v6732_v3 = vld [vmem:[%s8299_s2 + $0x738] sm:$0xff]  }
 0x1bf   :  { %6246 = vmatprep.subr.bf16.mxu0 %v6730_v57  ;;  %v6733_v5 = vld [vmem:[%s8299_s2 + $0x7b8] sm:$0xff]   ;;  %v2935_v6 = vcombine.high %v2919_v4, %v2919_v4 }
 0x1c0   :  { %6267 = vmatpush3.bf16.msra.mxu1 %v6729_v63 }
 0x1c1   :  { %6268 = vmatprep.subr.bf16.mxu1 %v6731_v1 }
 0x1c2   :  { %6247 = vmatpush3.bf16.msra.mxu0 %v6732_v3 }
 0x1c4   :  { %6269 = vmatpush3.bf16.msra.mxu1 %v6733_v5 }
 0x1c5   :  { %5099 = vmatmul.mubr.bf16.vlgmr.msra.gmra.mrb[52].mxu0 %v2919_v4 }
 0x1c7   :  { %5139 = vmatmul.mubr.bf16.vlgmr.msra.gmra.mrb[52].mxu1 %v2935_v6 }
 0x1d8   :  { %v5984_v7 = vpop.f32.mrb[28].mxu0 }
 0x1d9   :  { %v5985_v8 = vpop.f32.mrb[29].mxu0 }
 0x1da   :  { %v6006_v9 = vpop.f32.mrb[28].mxu1  ;;  %v5986_v10 = vadd.f32 %v5985_v8, %v5984_v7  ;;  %v5987_v12 = vpop.f32.mrb[30].mxu0 }
 0x1db   :  { %v6007_v13 = vpop.f32.mrb[29].mxu1  ;;  %v5988_v14 = vpop.f32.mrb[31].mxu0 }
 0x1dc   :  { %v4621_v15 = vadd.f32 %v5986_v10, %v4581_v2  ;;  %v6008_v42 = vadd.f32 %v6007_v13, %v6006_v9  ;;  %v6009_v11 = vpop.f32.mrb[30].mxu1 }
 0x1dd   :  { %v6010_v16 = vpop.f32.mrb[31].mxu1 }
 0x1de   :  { %v4661_v17 = vadd.f32 %v6008_v42, %v4621_v15 }
 0x1f8   :  { %v6028_v18 = vpop.f32.mrb[32].mxu0 }
 0x1f9   :  { %v6029_v19 = vpop.f32.mrb[33].mxu0 }
 0x1fa   :  { %v6050_v20 = vpop.f32.mrb[32].mxu1  ;;  %v6030_v21 = vadd.f32 %v6029_v19, %v6028_v18  ;;  %v6031_v22 = vpop.f32.mrb[34].mxu0 }
 0x1fb   :  { %v6051_v23 = vpop.f32.mrb[33].mxu1  ;;  %v6032_v24 = vpop.f32.mrb[35].mxu0 }
 0x1fc   :  { %v4701_v25 = vadd.f32 %v6030_v21, %v4661_v17  ;;  %v6052_v26 = vadd.f32 %v6051_v23, %v6050_v20  ;;  %v6053_v27 = vpop.f32.mrb[34].mxu1 }
 0x1fd   :  { %v6054_v28 = vpop.f32.mrb[35].mxu1 }
 0x1fe   :  { %v4741_v29 = vadd.f32 %v6052_v26, %v4701_v25 }
 0x218   :  { %v6072_v30 = vpop.f32.mrb[36].mxu0 }
 0x219   :  { %v6073_v31 = vpop.f32.mrb[37].mxu0 }
 0x21a   :  { %v6094_v32 = vpop.f32.mrb[36].mxu1  ;;  %v6074_v33 = vadd.f32 %v6073_v31, %v6072_v30  ;;  %v6075_v34 = vpop.f32.mrb[38].mxu0 }
 0x21b   :  { %v6095_v35 = vpop.f32.mrb[37].mxu1  ;;  %v6076_v36 = vpop.f32.mrb[39].mxu0 }
 0x21c   :  { %v4781_v37 = vadd.f32 %v6074_v33, %v4741_v29  ;;  %v6096_v38 = vadd.f32 %v6095_v35, %v6094_v32  ;;  %v6097_v39 = vpop.f32.mrb[38].mxu1  ;;  %v5154_v25 = vpop.permute.xlu0 %5153  ;;  %v5159_v36 = vld [vmem:[%s8302_s5] sm:$0x3]  ;;  %s6767_s5 = smov [#allocation3]  }
 0x21d   :  { %v6098_v40 = vpop.f32.mrb[39].mxu1  ;;  %s5199_s27 = sshll.u32 %s6767_s5, 4  ;;  %s5200_s27 = int_to_ptr.vmem [resolvable:$true] %s5199_s27 }
 0x21e   :  { %v4821_v41 = vadd.f32 %v6096_v38, %v4781_v37  ;;  %s6741_s28 = scalar_lea.vmem %s5200_s27, 32  ;;  %p6746_p1 = scmp.lt.s32.totalorder %s5200_s27, %s5200_s27 }
 0x21f   :  { %p6742_p0 = scmp.ne.s32.totalorder %s5200_s27, %s6741_s28  ;;  %p6747_p2 = scmp.lt.s32.totalorder %s6741_s28, %s6741_s28 }
 0x221   :  { %p6748_p3 = por %p6747_p2, %p6746_p1 }
 0x223   :  { %p6749_p4 = pnand %p6748_p3, %p6742_p0 }
 0x238   :  { %v6116_v43 = vpop.f32.mrb[40].mxu0 }
 0x239   :  { %v6117_v44 = vpop.f32.mrb[41].mxu0 }
 0x23a   :  { %v6138_v45 = vpop.f32.mrb[40].mxu1  ;;  %v6118_v46 = vadd.f32 %v6117_v44, %v6116_v43  ;;  %v6119_v47 = vpop.f32.mrb[42].mxu0 }
 0x23b   :  { %v6139_v48 = vpop.f32.mrb[41].mxu1  ;;  %v6120_v49 = vpop.f32.mrb[43].mxu0 }
 0x23c   :  { %v4861_v50 = vadd.f32 %v6118_v46, %v4821_v41  ;;  %v6140_v51 = vadd.f32 %v6139_v48, %v6138_v45  ;;  %v6141_v52 = vpop.f32.mrb[42].mxu1 }
 0x23d   :  { %v6142_v53 = vpop.f32.mrb[43].mxu1 }
 0x23e   :  { %v4901_v54 = vadd.f32 %v6140_v51, %v4861_v50 }
 0x258   :  { %v6160_v56 = vpop.f32.mrb[44].mxu0 }
 0x259   :  { %v6161_v57 = vpop.f32.mrb[45].mxu0 }
 0x25a   :  { %v6182_v55 = vpop.f32.mrb[44].mxu1  ;;  %v6162_v58 = vadd.f32 %v6161_v57, %v6160_v56  ;;  %v6163_v59 = vpop.f32.mrb[46].mxu0 }
 0x25b   :  { %v6183_v60 = vpop.f32.mrb[45].mxu1  ;;  %v6164_v61 = vpop.f32.mrb[47].mxu0 }
 0x25c   :  { %v4941_v62 = vadd.f32 %v6162_v58, %v4901_v54  ;;  %v6184_v63 = vadd.f32 %v6183_v60, %v6182_v55  ;;  %v6185_v0 = vpop.f32.mrb[46].mxu1 }
 0x25d   :  { %v6186_v1 = vpop.f32.mrb[47].mxu1 }
 0x25e   :  { %v4981_v2 = vadd.f32 %v6184_v63, %v4941_v62 }
 0x278   :  { %v6204_v3 = vpop.f32.mrb[48].mxu0 }
 0x279   :  { %v6205_v4 = vpop.f32.mrb[49].mxu0 }
 0x27a   :  { %v6226_v5 = vpop.f32.mrb[48].mxu1  ;;  %v6206_v6 = vadd.f32 %v6205_v4, %v6204_v3  ;;  %v6207_v7 = vpop.f32.mrb[50].mxu0 }
 0x27b   :  { %v6227_v8 = vpop.f32.mrb[49].mxu1  ;;  %v6208_v9 = vpop.f32.mrb[51].mxu0 }
 0x27c   :  { %v5021_v10 = vadd.f32 %v6206_v6, %v4981_v2  ;;  %v6228_v12 = vadd.f32 %v6227_v8, %v6226_v5  ;;  %v6229_v13 = vpop.f32.mrb[50].mxu1 }
 0x27d   :  { %v6230_v14 = vpop.f32.mrb[51].mxu1 }
 0x27e   :  { %v5061_v15 = vadd.f32 %v6228_v12, %v5021_v10 }
 0x298   :  { %v6248_v42 = vpop.f32.mrb[52].mxu0 }
 0x299   :  { %v6249_v11 = vpop.f32.mrb[53].mxu0 }
 0x29a   :  { %v6270_v16 = vpop.f32.mrb[52].mxu1  ;;  %v6250_v17 = vadd.f32 %v6249_v11, %v6248_v42  ;;  %v6251_v18 = vpop.f32.mrb[54].mxu0 }
 0x29b   :  { %v6271_v19 = vpop.f32.mrb[53].mxu1  ;;  %v6252_v20 = vpop.f32.mrb[55].mxu0 }
 0x29c   :  { %v5101_v21 = vadd.f32 %v6250_v17, %v5061_v15  ;;  %v6272_v22 = vadd.f32 %v6271_v19, %v6270_v16  ;;  %v6273_v23 = vpop.f32.mrb[54].mxu1 }
 0x29d   :  { %v6274_v24 = vpop.f32.mrb[55].mxu1 }
 0x29e   :  { %v5141_v26 = vadd.f32 %v6272_v22, %v5101_v21 }
 0x2a0   :  { %v5156_v27 = vadd.f32 %v5154_v25, %v5141_v26 }
 0x2a2   :  { %v5160_v28 = vsel %vm5157_vm0, %v5156_v27, -inf  ;;  %5158 = vst.msk [vmem:[#allocation3] sm:$0x3] %vm5157_vm0, %v5156_v27 }
 0x2a3   :  { %5161 = vmax.xlane.f32.xlu0 %v5160_v28 }
 0x330   :  { %v5162_v29 = vpop.xlane.xlu0 %5161 }
 0x331   :  { %v5163_v30 = vsub.f32 %v5156_v27, %v5162_v29 }
 0x333   :  { %v5164_v31 = vmul.f32 1.442695, %v5163_v30 }
 0x335   :  { %6735 = vpow2.f32 %v5164_v31 }
 0x33f   :  { %v6736_v32 = vpop.eup %6735 }
 0x340   :  { %v5166_v33 = vsel %vm5157_vm0, %v6736_v32, 0.0 }
 0x341   :  { %5167 = vadd.xlane.f32.xlu1 %v5166_v33 }
 0x3ce   :  { %v5168_v34 = vpop.xlane.xlu1 %5167 }
 0x3cf   :  { %6737 = vrcp.f32 %v5168_v34 }
 0x3d0   :  { %6739 = vlog2.f32 %v5168_v34 }
 0x3d9   :  { %v6738_v35 = vpop.eup %6737 }
 0x3da   :  { %v6740_v37 = vpop.eup %6739  ;;  %v5170_v38 = vmul.f32 %v6738_v35, %v6736_v32 }
 0x3db   :  { %v5182_v39 = vmul.f32 0.6931472, %v6740_v37 }
 0x3dc   :  { %v5171_v40 = vmul.f32 %v5170_v38, %v5159_v36  ;;  %v5175_v46 = vadd.f32 0.5, %v5170_v38 }
 0x3dd   :  { %v5183_v41 = vsub.f32 %v5163_v30, %v5182_v39 }
 0x3de   :  { %v5172_v43 = vsel %vm5157_vm0, %v5171_v40, 0.0 }
 0x3df   :  { %5173 = vadd.xlane.f32.xlu1 %v5172_v43  ;;  %v5184_v44 = vmul.f32 %v5183_v41, %v5159_v36 }
 0x3e1   :  { %v5185_v45 = vsel %vm5157_vm0, %v5184_v44, 0.0 }
 0x3e3   :  { %5186 = vadd.xlane.f32.xlu1 %v5185_v45 }
 0x46c   :  { %v5174_v47 = vpop.xlane.xlu1 %5173 }
 0x46d   :  { %v5176_v48 = vsub.f32 %v5175_v46, %v5174_v47 }
 0x46f   :  { %v5177_v49 = vmax.f32 %v5176_v48, 0.0 }
 0x471   :  { %v5178_v50 = vsel %vm5157_vm0, %v5177_v49, 0.0 }
 0x472   :  { %5179 = vadd.xlane.f32.xlu1 %v5178_v50 }
 0x473   :  { %6752 = shalt.err (!%p6749_p4)
}
 0x474   :  { %s6753_s8 = scalar_lea.hbm %s8303_s6, 32 }
 0x475   :  { %p6754_p5 = scmp.ne.s32.totalorder %s8303_s6, %s6753_s8  ;;  %p6757_p6 = scmp.lt.u32.totalorder %s6753_s8, %s8303_s6 }
 0x477   :  { %p6759_p7 = pnand %p6757_p6, %p6754_p5 }
 0x479   :  { %6762 = shalt.err (!%p6759_p7)
}
 0x47a   :  { %5202 = dma.vmem_to_hbm [thread:$0]  %s5200_s27, 32, %s8303_s6, [#allocation4]   ;;  %v5187_v51 = vpop.xlane.xlu1 %5186  ;;  %vm5191_vm1 = vcmask 1024  }
 0x47b   :  { %v5188_v52 = vsub.f32 0.0, %v5187_v51 }
 0x47d   :  { %v5189_v53 = vmul.f32 0.5, %v5188_v52 }
 0x4ff   :  { %v5180_v54 = vpop.xlane.xlu1 %5179 }
 0x500   :  { %v5190_v56 = vadd.f32 %v5189_v53, %v5180_v54 }
 0x502   :  { %5192 = vst.msk [vmem:[%s8304_s7] sm:$0x3] %vm5191_vm1, %v5190_v56 }
 0x503   :  { %6763 = dma.done.wait [#allocation4], 32  }
 0x504   :  { %6764 = vsyncadd [#allocation4], 4294967264 }
 0x505   :  { %5210 = vsyncpa [#allocation4], 1 }

</bundles_post_ra>
